<compile_context>
chip_gen: v7x
topology: tpu7x:2x2x1
jax: 0.10.0
libtpu: 0.0.40
codegen_flags: <defaults>
</compile_context>

<pallas_src>
import numpy as np
import jax
import jax.numpy as jnp
from jax import lax
from jax.experimental import pallas as pl
from jax.experimental.pallas import tpu as pltpu

# ---- model hyper-parameters (small, consistent with a CLIP text encoder) ----
VOCAB = 128          # synthetic vocab (power of 2 -> lane-aligned gather matmul)
SEQ = 8              # model_max_length
D = 32               # hidden size
HEADS = 4
HEAD_DIM = D // HEADS
FFN = 4 * D          # 128
LAYERS = 2
EPS = 1e-5

BOS_ID = 1
EOS_ID = 2
PAD_ID = 0

# stacked small-parameter layout: per layer [ln1_g, ln1_b, ln2_g, ln2_b, bo, b2],
# then [lnf_g, lnf_b] at the end.
NVEC = 6 * LAYERS + 2


# ----------------------------- Pallas kernel --------------------------------
def _layer_norm(x, gamma, beta):
    # x: [N, D], gamma/beta: [1, D]  (f32 math)
    mu = jnp.mean(x, axis=-1, keepdims=True)
    xc = x - mu
    var = jnp.mean(xc * xc, axis=-1, keepdims=True)
    return xc * lax.rsqrt(var + EPS) * gamma + beta


def encoder_kernel(ids_ref, tok_emb_ref, pos_ref,
                   wqkv_ref, wo_ref, w1_ref, w2_ref,
                   vec_ref, bqkv_ref, b1_ref,
                   out_ref):
    BS = ids_ref.shape[0]              # B * SEQ (static)
    B = BS // SEQ
    scale = 1.0 / np.sqrt(HEAD_DIM)

    # ---- fused embedding gather (one-hot matmul, exact in f32) + pos add ----
    ids = ids_ref[...]                                               # [BS, 1] int32
    onehot = (lax.broadcasted_iota(jnp.int32, (BS, VOCAB), 1) == ids
              ).astype(jnp.float32)                                  # [BS, VOCAB]
    x = jnp.dot(onehot, tok_emb_ref[...],
                preferred_element_type=jnp.float32) + pos_ref[...]   # [BS, D]

    # causal mask (CLIP text encoder is causal), shared across batch & heads
    rows = lax.broadcasted_iota(jnp.int32, (SEQ, SEQ), 0)
    cols = lax.broadcasted_iota(jnp.int32, (SEQ, SEQ), 1)
    causal = (cols <= rows)[None, :, :]                              # [1, S, S]

    for l in range(LAYERS):
        base = 6 * l
        # ---------------- attention block (pre-LN, causal) ----------------
        h = _layer_norm(x, vec_ref[base + 0:base + 1, :], vec_ref[base + 1:base + 2, :])
        qkv = jnp.dot(h.astype(jnp.bfloat16), wqkv_ref[l],
                      preferred_element_type=jnp.float32) + bqkv_ref[l:l + 1, :]  # [BS, 3D]

        wo = wo_ref[l]                                               # [D, D] bf16
        attn = jnp.zeros((BS, D), jnp.float32)
        for hd in range(HEADS):
            lo = hd * HEAD_DIM
            qh = qkv[:, lo:lo + HEAD_DIM].reshape(B, SEQ, HEAD_DIM)
            kh = qkv[:, D + lo:D + lo + HEAD_DIM].reshape(B, SEQ, HEAD_DIM)
            vh = qkv[:, 2 * D + lo:2 * D + lo + HEAD_DIM].reshape(B, SEQ, HEAD_DIM)

            scores = lax.dot_general(qh, kh, (((2,), (2,)), ((0,), (0,))),
                                     preferred_element_type=jnp.float32) * scale   # [B,S,S]
            scores = jnp.where(causal, scores, -1e30)
            m = jnp.max(scores, axis=-1, keepdims=True)
            p = jnp.exp(scores - m)
            p = p * pl.reciprocal(jnp.sum(p, axis=-1, keepdims=True), approx=True)
            oh = lax.dot_general(p, vh, (((2,), (1,)), ((0,), (0,))),
                                 preferred_element_type=jnp.float32)               # [B,S,HD]
            # accumulate through Wo slice (no lane-axis concat of head outputs)
            attn = attn + jnp.dot(oh.reshape(BS, HEAD_DIM).astype(jnp.bfloat16),
                                  wo[lo:lo + HEAD_DIM, :],
                                  preferred_element_type=jnp.float32)
        x = x + attn + vec_ref[base + 4:base + 5, :]                 # + bo

        # ---------------- MLP block (pre-LN, quickGELU) --------------------
        h = _layer_norm(x, vec_ref[base + 2:base + 3, :], vec_ref[base + 3:base + 4, :])
        h1 = jnp.dot(h.astype(jnp.bfloat16), w1_ref[l],
                     preferred_element_type=jnp.float32) + b1_ref[l:l + 1, :]       # [BS, FFN]
        # quickGELU: x * sigmoid(1.702 x), divide routed through EUP reciprocal
        h1 = h1 * pl.reciprocal(1.0 + jnp.exp(-1.702 * h1), approx=True)
        x = x + jnp.dot(h1.astype(jnp.bfloat16), w2_ref[l],
                        preferred_element_type=jnp.float32) + vec_ref[base + 5:base + 6, :]  # + b2

    # final layer norm -> last_hidden_state
    x = _layer_norm(x, vec_ref[6 * LAYERS:6 * LAYERS + 1, :],
                    vec_ref[6 * LAYERS + 1:6 * LAYERS + 2, :])
    out_ref[...] = x.reshape(B, SEQ, D).astype(out_ref.dtype)


# ------------------------------ JAX wrapper ----------------------------------
def init_params(key):
    ks = jax.random.split(key, 8)
    s = 0.02
    ones = jnp.ones((1, D), jnp.float32)
    zeros = jnp.zeros((1, D), jnp.float32)
    vec = jnp.concatenate([ones, zeros, ones, zeros, zeros, zeros] * LAYERS
                          + [ones, zeros], axis=0)                  # [NVEC, D]
    return {
        "tok_emb": jax.random.normal(ks[0], (VOCAB, D), jnp.float32) * s,
        "pos_emb": jax.random.normal(ks[1], (SEQ, D), jnp.float32) * s,
        # dense matmul weights in bf16 (MXU-native on v5e/v6e/v7x); accumulation
        # stays f32 via preferred_element_type in the kernel.
        "wqkv": (jax.random.normal(ks[2], (LAYERS, D, 3 * D), jnp.float32) * s).astype(jnp.bfloat16),
        "wo":   (jax.random.normal(ks[3], (LAYERS, D, D), jnp.float32) * s).astype(jnp.bfloat16),
        "w1":   (jax.random.normal(ks[4], (LAYERS, D, FFN), jnp.float32) * s).astype(jnp.bfloat16),
        "w2":   (jax.random.normal(ks[5], (LAYERS, FFN, D), jnp.float32) * s).astype(jnp.bfloat16),
        "vec":  vec,                                                 # LN gammas/betas + bo + b2 + lnf
        "bqkv": jnp.zeros((LAYERS, 3 * D), jnp.float32),
        "b1":   jnp.zeros((LAYERS, FFN), jnp.float32),
    }


def clip_text_encode(token_ids, params):
    """token_ids: [B, S] int -> last_hidden_state [B, S, D] float32 (single kernel call)."""
    B, S = token_ids.shape
    assert S == SEQ
    ids = token_ids.astype(jnp.int32).reshape(B * SEQ, 1)            # [B*S, 1]
    pos = jnp.tile(params["pos_emb"], (B, 1))                        # [B*S, D]

    args = (ids, params["tok_emb"], pos,
            params["wqkv"], params["wo"], params["w1"], params["w2"],
            params["vec"], params["bqkv"], params["b1"])

    return pl.pallas_call(
        encoder_kernel,
        out_shape=jax.ShapeDtypeStruct((B, SEQ, D), jnp.float32),
        in_specs=[pl.BlockSpec(memory_space=pltpu.MemorySpace.VMEM) for _ in args],
        out_specs=pl.BlockSpec(memory_space=pltpu.MemorySpace.VMEM),
    )(*args)


def tokenize_empty_prompt():
    """Synthetic tokenizer output for the empty ('') prompt: [BOS, EOS, pad...]."""
    # TODO(synk): real HF CLIPTokenizer / pretrained CLIP weights are not reproducible
    # in-script; a synthetic tokenizer + random weights stand in for them.
    ids = np.full((1, SEQ), PAD_ID, dtype=np.int32)
    ids[0, 0] = BOS_ID
    ids[0, 1] = EOS_ID
    return jnp.asarray(ids)


class TextEncoder:
    """Mirrors PyTorch TextEncoder.forward:
    prompt_embeds = cat([encoder(uncond_ids), encoder(text_ids)], dim=0)."""

    def __init__(self, params):
        self.params = params

    def __call__(self, text_input):
        uncond_input = tokenize_empty_prompt()                       # [1, S]
        # Batching the two prompts == encoding separately + concatenating
        # (the transformer is batch-independent).
        ids = jnp.concatenate([uncond_input, text_input.astype(jnp.int32)], axis=0)
        prompt_embeds = clip_text_encode(ids, self.params)           # [2, S, D]
        return prompt_embeds


if __name__ == "__main__":
    key = jax.random.PRNGKey(0)
    pkey, ikey = jax.random.split(key)
    params = init_params(pkey)

    # synthetic "tokenized" user prompt: [BOS, tok, tok, ..., EOS, pad]
    body = jax.random.randint(ikey, (SEQ - 3,), 3, VOCAB, dtype=jnp.int32)
    text_input = jnp.concatenate(
        [jnp.array([BOS_ID], jnp.int32), body,
         jnp.array([EOS_ID, PAD_ID], jnp.int32)])[None, :]           # [1, SEQ]

    enc = TextEncoder(params)
    prompt_embeds = enc(text_input)
    prompt_embeds = jax.block_until_ready(prompt_embeds)

    assert prompt_embeds.shape == (2, SEQ, D)
    assert prompt_embeds.dtype == jnp.float32
    assert bool(jnp.all(jnp.isfinite(prompt_embeds)))
    print("KERNEL_OK")
</pallas_src>

<mosaic_0001>
module attributes {stable_mosaic.version = 11 : i64} {
  func.func @encoder_kernel(%arg0: memref<16x1xi32, #tpu.memory_space<vmem>>, %arg1: memref<128x32xf32, #tpu.memory_space<vmem>>, %arg2: memref<16x32xf32, #tpu.memory_space<vmem>>, %arg3: memref<2x32x96xbf16, #tpu.memory_space<vmem>>, %arg4: memref<2x32x32xbf16, #tpu.memory_space<vmem>>, %arg5: memref<2x32x128xbf16, #tpu.memory_space<vmem>>, %arg6: memref<2x128x32xbf16, #tpu.memory_space<vmem>>, %arg7: memref<14x32xf32, #tpu.memory_space<vmem>>, %arg8: memref<2x96xf32, #tpu.memory_space<vmem>>, %arg9: memref<2x128xf32, #tpu.memory_space<vmem>>, %arg10: memref<2x8x32xf32, #tpu.memory_space<vmem>>) attributes {dimension_semantics = [], scalar_prefetch = 0 : i64, scratch_operands = 0 : i64, tpu.core_type = #tpu.core_type<tc>} {
    %c0 = arith.constant 0 : index
    %c0_0 = arith.constant 0 : index
    %0 = vector.load %arg0[%c0, %c0_0] : memref<16x1xi32, #tpu.memory_space<vmem>>, vector<16x1xi32>
    %1 = tpu.iota {dimensions = array<i32: 1>} : vector<16x128xi32>
    %2 = vector.broadcast %0 : vector<16x1xi32> to vector<16x128xi32>
    %3 = arith.cmpi eq, %1, %2 : vector<16x128xi32>
    %4 = arith.extui %3 : vector<16x128xi1> to vector<16x128xi32>
    %5 = arith.sitofp %4 : vector<16x128xi32> to vector<16x128xf32>
    %c0_1 = arith.constant 0 : index
    %c0_2 = arith.constant 0 : index
    %6 = vector.load %arg1[%c0_1, %c0_2] : memref<128x32xf32, #tpu.memory_space<vmem>>, vector<128x32xf32>
    %cst = arith.constant dense<0.000000e+00> : vector<16x32xf32>
    %7 = tpu.matmul %5, %6, %cst {dimension_numbers = #tpu.dot_dimension_numbers<[1], [0], [0], [1], [0, 0, 1, 1], [], []>} : vector<16x128xf32>, vector<128x32xf32>, vector<16x32xf32> -> vector<16x32xf32>
    %c0_3 = arith.constant 0 : index
    %c0_4 = arith.constant 0 : index
    %8 = vector.load %arg2[%c0_3, %c0_4] : memref<16x32xf32, #tpu.memory_space<vmem>>, vector<16x32xf32>
    %9 = arith.addf %7, %8 : vector<16x32xf32>
    %10 = tpu.iota {dimensions = array<i32: 0>} : vector<8x8xi32>
    %11 = tpu.iota {dimensions = array<i32: 1>} : vector<8x8xi32>
    %12 = arith.cmpi sle, %11, %10 : vector<8x8xi32>
    %13 = vector.shape_cast %12 : vector<8x8xi1> to vector<1x8x8xi1>
    %c0_5 = arith.constant 0 : index
    %c0_6 = arith.constant 0 : index
    %14 = vector.load %arg7[%c0_5, %c0_6] : memref<14x32xf32, #tpu.memory_space<vmem>>, vector<1x32xf32>
    %c1 = arith.constant 1 : index
    %c0_7 = arith.constant 0 : index
    %15 = vector.load %arg7[%c1, %c0_7] : memref<14x32xf32, #tpu.memory_space<vmem>>, vector<1x32xf32>
    %cst_8 = arith.constant dense<0.000000e+00> : vector<16xf32>
    %16 = vector.multi_reduction <add>, %9, %cst_8 [1] : vector<16x32xf32> to vector<16xf32>
    %17 = vector.shape_cast %16 : vector<16xf32> to vector<16x1xf32>
    %cst_9 = arith.constant 3.200000e+01 : f32
    %18 = vector.broadcast %cst_9 : f32 to vector<16x1xf32>
    %19 = arith.divf %17, %18 : vector<16x1xf32>
    %20 = vector.broadcast %19 : vector<16x1xf32> to vector<16x32xf32>
    %21 = arith.subf %9, %20 : vector<16x32xf32>
    %22 = arith.mulf %21, %21 : vector<16x32xf32>
    %cst_10 = arith.constant dense<0.000000e+00> : vector<16xf32>
    %23 = vector.multi_reduction <add>, %22, %cst_10 [1] : vector<16x32xf32> to vector<16xf32>
    %24 = vector.shape_cast %23 : vector<16xf32> to vector<16x1xf32>
    %cst_11 = arith.constant 3.200000e+01 : f32
    %25 = vector.broadcast %cst_11 : f32 to vector<16x1xf32>
    %26 = arith.divf %24, %25 : vector<16x1xf32>
    %cst_12 = arith.constant 9.99999974E-6 : f32
    %27 = vector.broadcast %cst_12 : f32 to vector<16x1xf32>
    %28 = arith.addf %26, %27 : vector<16x1xf32>
    %29 = math.rsqrt %28 : vector<16x1xf32>
    %30 = vector.broadcast %29 : vector<16x1xf32> to vector<16x32xf32>
    %31 = arith.mulf %21, %30 : vector<16x32xf32>
    %32 = vector.broadcast %14 : vector<1x32xf32> to vector<16x32xf32>
    %33 = arith.mulf %31, %32 : vector<16x32xf32>
    %34 = vector.broadcast %15 : vector<1x32xf32> to vector<16x32xf32>
    %35 = arith.addf %33, %34 : vector<16x32xf32>
    %36 = arith.truncf %35 : vector<16x32xf32> to vector<16x32xbf16>
    %c0_13 = arith.constant 0 : index
    %c0_14 = arith.constant 0 : index
    %c0_15 = arith.constant 0 : index
    %37 = vector.load %arg3[%c0_13, %c0_14, %c0_15] : memref<2x32x96xbf16, #tpu.memory_space<vmem>>, vector<1x32x96xbf16>
    %38 = vector.shape_cast %37 : vector<1x32x96xbf16> to vector<32x96xbf16>
    %cst_16 = arith.constant dense<0.000000e+00> : vector<16x96xf32>
    %39 = tpu.matmul %36, %38, %cst_16 {dimension_numbers = #tpu.dot_dimension_numbers<[1], [0], [0], [1], [0, 0, 1, 1], [], []>} : vector<16x32xbf16>, vector<32x96xbf16>, vector<16x96xf32> -> vector<16x96xf32>
    %c0_17 = arith.constant 0 : index
    %c0_18 = arith.constant 0 : index
    %40 = vector.load %arg8[%c0_17, %c0_18] : memref<2x96xf32, #tpu.memory_space<vmem>>, vector<1x96xf32>
    %41 = vector.broadcast %40 : vector<1x96xf32> to vector<16x96xf32>
    %42 = arith.addf %39, %41 : vector<16x96xf32>
    %c0_19 = arith.constant 0 : index
    %c0_20 = arith.constant 0 : index
    %c0_21 = arith.constant 0 : index
    %43 = vector.load %arg4[%c0_19, %c0_20, %c0_21] : memref<2x32x32xbf16, #tpu.memory_space<vmem>>, vector<1x32x32xbf16>
    %44 = vector.shape_cast %43 : vector<1x32x32xbf16> to vector<32x32xbf16>
    %cst_22 = arith.constant 0.000000e+00 : f32
    %45 = vector.broadcast %cst_22 : f32 to vector<16x32xf32>
    %46 = vector.extract_strided_slice %42 {offsets = [0, 0], sizes = [16, 8], strides = [1, 1]} : vector<16x96xf32> to vector<16x8xf32>
    %47 = vector.shape_cast %46 : vector<16x8xf32> to vector<2x8x8xf32>
    %48 = vector.extract_strided_slice %42 {offsets = [0, 32], sizes = [16, 8], strides = [1, 1]} : vector<16x96xf32> to vector<16x8xf32>
    %49 = vector.shape_cast %48 : vector<16x8xf32> to vector<2x8x8xf32>
    %50 = vector.extract_strided_slice %42 {offsets = [0, 64], sizes = [16, 8], strides = [1, 1]} : vector<16x96xf32> to vector<16x8xf32>
    %51 = vector.shape_cast %50 : vector<16x8xf32> to vector<2x8x8xf32>
    %cst_23 = arith.constant dense<0.000000e+00> : vector<2x8x8xf32>
    %52 = tpu.matmul %47, %49, %cst_23 {dimension_numbers = #tpu.dot_dimension_numbers<[2], [2], [1], [1], [0, 0, 0, 1, 1, 1], [0], [0]>} : vector<2x8x8xf32>, vector<2x8x8xf32>, vector<2x8x8xf32> -> vector<2x8x8xf32>
    %cst_24 = arith.constant 0.353553385 : f32
    %53 = vector.broadcast %cst_24 : f32 to vector<2x8x8xf32>
    %54 = arith.mulf %52, %53 : vector<2x8x8xf32>
    %cst_25 = arith.constant -1.000000e+30 : f32
    %55 = vector.shape_cast %13 : vector<1x8x8xi1> to vector<1x8x8xi1>
    %56 = vector.broadcast %55 : vector<1x8x8xi1> to vector<2x8x8xi1>
    %57 = vector.broadcast %cst_25 : f32 to vector<2x8x8xf32>
    %58 = arith.select %56, %54, %57 : vector<2x8x8xi1>, vector<2x8x8xf32>
    %cst_26 = arith.constant dense<0xFF800000> : vector<2x8xf32>
    %59 = vector.multi_reduction <maximumf>, %58, %cst_26 [2] : vector<2x8x8xf32> to vector<2x8xf32>
    %60 = vector.shape_cast %59 : vector<2x8xf32> to vector<2x8x1xf32>
    %61 = vector.broadcast %60 : vector<2x8x1xf32> to vector<2x8x8xf32>
    %62 = arith.subf %58, %61 : vector<2x8x8xf32>
    %63 = math.exp %62 : vector<2x8x8xf32>
    %cst_27 = arith.constant dense<0.000000e+00> : vector<2x8xf32>
    %64 = vector.multi_reduction <add>, %63, %cst_27 [2] : vector<2x8x8xf32> to vector<2x8xf32>
    %65 = vector.shape_cast %64 : vector<2x8xf32> to vector<2x8x1xf32>
    %66 = tpu.reciprocal %65 {approx = true} : vector<2x8x1xf32> -> vector<2x8x1xf32>
    %67 = vector.broadcast %66 : vector<2x8x1xf32> to vector<2x8x8xf32>
    %68 = arith.mulf %63, %67 : vector<2x8x8xf32>
    %cst_28 = arith.constant dense<0.000000e+00> : vector<2x8x8xf32>
    %69 = tpu.matmul %68, %51, %cst_28 {dimension_numbers = #tpu.dot_dimension_numbers<[2], [1], [1], [2], [0, 0, 0, 1, 1, 2], [0], [0]>} : vector<2x8x8xf32>, vector<2x8x8xf32>, vector<2x8x8xf32> -> vector<2x8x8xf32>
    %70 = vector.shape_cast %69 : vector<2x8x8xf32> to vector<16x8xf32>
    %71 = arith.truncf %70 : vector<16x8xf32> to vector<16x8xbf16>
    %72 = vector.extract_strided_slice %44 {offsets = [0, 0], sizes = [8, 32], strides = [1, 1]} : vector<32x32xbf16> to vector<8x32xbf16>
    %cst_29 = arith.constant dense<0.000000e+00> : vector<16x32xf32>
    %73 = tpu.matmul %71, %72, %cst_29 {dimension_numbers = #tpu.dot_dimension_numbers<[1], [0], [0], [1], [0, 0, 1, 1], [], []>} : vector<16x8xbf16>, vector<8x32xbf16>, vector<16x32xf32> -> vector<16x32xf32>
    %74 = arith.addf %45, %73 : vector<16x32xf32>
    %75 = vector.extract_strided_slice %42 {offsets = [0, 8], sizes = [16, 8], strides = [1, 1]} : vector<16x96xf32> to vector<16x8xf32>
    %76 = vector.shape_cast %75 : vector<16x8xf32> to vector<2x8x8xf32>
    %77 = vector.extract_strided_slice %42 {offsets = [0, 40], sizes = [16, 8], strides = [1, 1]} : vector<16x96xf32> to vector<16x8xf32>
    %78 = vector.shape_cast %77 : vector<16x8xf32> to vector<2x8x8xf32>
    %79 = vector.extract_strided_slice %42 {offsets = [0, 72], sizes = [16, 8], strides = [1, 1]} : vector<16x96xf32> to vector<16x8xf32>
    %80 = vector.shape_cast %79 : vector<16x8xf32> to vector<2x8x8xf32>
    %cst_30 = arith.constant dense<0.000000e+00> : vector<2x8x8xf32>
    %81 = tpu.matmul %76, %78, %cst_30 {dimension_numbers = #tpu.dot_dimension_numbers<[2], [2], [1], [1], [0, 0, 0, 1, 1, 1], [0], [0]>} : vector<2x8x8xf32>, vector<2x8x8xf32>, vector<2x8x8xf32> -> vector<2x8x8xf32>
    %cst_31 = arith.constant 0.353553385 : f32
    %82 = vector.broadcast %cst_31 : f32 to vector<2x8x8xf32>
    %83 = arith.mulf %81, %82 : vector<2x8x8xf32>
    %cst_32 = arith.constant -1.000000e+30 : f32
    %84 = vector.shape_cast %13 : vector<1x8x8xi1> to vector<1x8x8xi1>
    %85 = vector.broadcast %84 : vector<1x8x8xi1> to vector<2x8x8xi1>
    %86 = vector.broadcast %cst_32 : f32 to vector<2x8x8xf32>
    %87 = arith.select %85, %83, %86 : vector<2x8x8xi1>, vector<2x8x8xf32>
    %cst_33 = arith.constant dense<0xFF800000> : vector<2x8xf32>
    %88 = vector.multi_reduction <maximumf>, %87, %cst_33 [2] : vector<2x8x8xf32> to vector<2x8xf32>
    %89 = vector.shape_cast %88 : vector<2x8xf32> to vector<2x8x1xf32>
    %90 = vector.broadcast %89 : vector<2x8x1xf32> to vector<2x8x8xf32>
    %91 = arith.subf %87, %90 : vector<2x8x8xf32>
    %92 = math.exp %91 : vector<2x8x8xf32>
    %cst_34 = arith.constant dense<0.000000e+00> : vector<2x8xf32>
    %93 = vector.multi_reduction <add>, %92, %cst_34 [2] : vector<2x8x8xf32> to vector<2x8xf32>
    %94 = vector.shape_cast %93 : vector<2x8xf32> to vector<2x8x1xf32>
    %95 = tpu.reciprocal %94 {approx = true} : vector<2x8x1xf32> -> vector<2x8x1xf32>
    %96 = vector.broadcast %95 : vector<2x8x1xf32> to vector<2x8x8xf32>
    %97 = arith.mulf %92, %96 : vector<2x8x8xf32>
    %cst_35 = arith.constant dense<0.000000e+00> : vector<2x8x8xf32>
    %98 = tpu.matmul %97, %80, %cst_35 {dimension_numbers = #tpu.dot_dimension_numbers<[2], [1], [1], [2], [0, 0, 0, 1, 1, 2], [0], [0]>} : vector<2x8x8xf32>, vector<2x8x8xf32>, vector<2x8x8xf32> -> vector<2x8x8xf32>
    %99 = vector.shape_cast %98 : vector<2x8x8xf32> to vector<16x8xf32>
    %100 = arith.truncf %99 : vector<16x8xf32> to vector<16x8xbf16>
    %101 = vector.extract_strided_slice %44 {offsets = [8, 0], sizes = [8, 32], strides = [1, 1]} : vector<32x32xbf16> to vector<8x32xbf16>
    %cst_36 = arith.constant dense<0.000000e+00> : vector<16x32xf32>
    %102 = tpu.matmul %100, %101, %cst_36 {dimension_numbers = #tpu.dot_dimension_numbers<[1], [0], [0], [1], [0, 0, 1, 1], [], []>} : vector<16x8xbf16>, vector<8x32xbf16>, vector<16x32xf32> -> vector<16x32xf32>
    %103 = arith.addf %74, %102 : vector<16x32xf32>
    %104 = vector.extract_strided_slice %42 {offsets = [0, 16], sizes = [16, 8], strides = [1, 1]} : vector<16x96xf32> to vector<16x8xf32>
    %105 = vector.shape_cast %104 : vector<16x8xf32> to vector<2x8x8xf32>
    %106 = vector.extract_strided_slice %42 {offsets = [0, 48], sizes = [16, 8], strides = [1, 1]} : vector<16x96xf32> to vector<16x8xf32>
    %107 = vector.shape_cast %106 : vector<16x8xf32> to vector<2x8x8xf32>
    %108 = vector.extract_strided_slice %42 {offsets = [0, 80], sizes = [16, 8], strides = [1, 1]} : vector<16x96xf32> to vector<16x8xf32>
    %109 = vector.shape_cast %108 : vector<16x8xf32> to vector<2x8x8xf32>
    %cst_37 = arith.constant dense<0.000000e+00> : vector<2x8x8xf32>
    %110 = tpu.matmul %105, %107, %cst_37 {dimension_numbers = #tpu.dot_dimension_numbers<[2], [2], [1], [1], [0, 0, 0, 1, 1, 1], [0], [0]>} : vector<2x8x8xf32>, vector<2x8x8xf32>, vector<2x8x8xf32> -> vector<2x8x8xf32>
    %cst_38 = arith.constant 0.353553385 : f32
    %111 = vector.broadcast %cst_38 : f32 to vector<2x8x8xf32>
    %112 = arith.mulf %110, %111 : vector<2x8x8xf32>
    %cst_39 = arith.constant -1.000000e+30 : f32
    %113 = vector.shape_cast %13 : vector<1x8x8xi1> to vector<1x8x8xi1>
    %114 = vector.broadcast %113 : vector<1x8x8xi1> to vector<2x8x8xi1>
    %115 = vector.broadcast %cst_39 : f32 to vector<2x8x8xf32>
    %116 = arith.select %114, %112, %115 : vector<2x8x8xi1>, vector<2x8x8xf32>
    %cst_40 = arith.constant dense<0xFF800000> : vector<2x8xf32>
    %117 = vector.multi_reduction <maximumf>, %116, %cst_40 [2] : vector<2x8x8xf32> to vector<2x8xf32>
    %118 = vector.shape_cast %117 : vector<2x8xf32> to vector<2x8x1xf32>
    %119 = vector.broadcast %118 : vector<2x8x1xf32> to vector<2x8x8xf32>
    %120 = arith.subf %116, %119 : vector<2x8x8xf32>
    %121 = math.exp %120 : vector<2x8x8xf32>
    %cst_41 = arith.constant dense<0.000000e+00> : vector<2x8xf32>
    %122 = vector.multi_reduction <add>, %121, %cst_41 [2] : vector<2x8x8xf32> to vector<2x8xf32>
    %123 = vector.shape_cast %122 : vector<2x8xf32> to vector<2x8x1xf32>
    %124 = tpu.reciprocal %123 {approx = true} : vector<2x8x1xf32> -> vector<2x8x1xf32>
    %125 = vector.broadcast %124 : vector<2x8x1xf32> to vector<2x8x8xf32>
    %126 = arith.mulf %121, %125 : vector<2x8x8xf32>
    %cst_42 = arith.constant dense<0.000000e+00> : vector<2x8x8xf32>
    %127 = tpu.matmul %126, %109, %cst_42 {dimension_numbers = #tpu.dot_dimension_numbers<[2], [1], [1], [2], [0, 0, 0, 1, 1, 2], [0], [0]>} : vector<2x8x8xf32>, vector<2x8x8xf32>, vector<2x8x8xf32> -> vector<2x8x8xf32>
    %128 = vector.shape_cast %127 : vector<2x8x8xf32> to vector<16x8xf32>
    %129 = arith.truncf %128 : vector<16x8xf32> to vector<16x8xbf16>
    %130 = vector.extract_strided_slice %44 {offsets = [16, 0], sizes = [8, 32], strides = [1, 1]} : vector<32x32xbf16> to vector<8x32xbf16>
    %cst_43 = arith.constant dense<0.000000e+00> : vector<16x32xf32>
    %131 = tpu.matmul %129, %130, %cst_43 {dimension_numbers = #tpu.dot_dimension_numbers<[1], [0], [0], [1], [0, 0, 1, 1], [], []>} : vector<16x8xbf16>, vector<8x32xbf16>, vector<16x32xf32> -> vector<16x32xf32>
    %132 = arith.addf %103, %131 : vector<16x32xf32>
    %133 = vector.extract_strided_slice %42 {offsets = [0, 24], sizes = [16, 8], strides = [1, 1]} : vector<16x96xf32> to vector<16x8xf32>
    %134 = vector.shape_cast %133 : vector<16x8xf32> to vector<2x8x8xf32>
    %135 = vector.extract_strided_slice %42 {offsets = [0, 56], sizes = [16, 8], strides = [1, 1]} : vector<16x96xf32> to vector<16x8xf32>
    %136 = vector.shape_cast %135 : vector<16x8xf32> to vector<2x8x8xf32>
    %137 = vector.extract_strided_slice %42 {offsets = [0, 88], sizes = [16, 8], strides = [1, 1]} : vector<16x96xf32> to vector<16x8xf32>
    %138 = vector.shape_cast %137 : vector<16x8xf32> to vector<2x8x8xf32>
    %cst_44 = arith.constant dense<0.000000e+00> : vector<2x8x8xf32>
    %139 = tpu.matmul %134, %136, %cst_44 {dimension_numbers = #tpu.dot_dimension_numbers<[2], [2], [1], [1], [0, 0, 0, 1, 1, 1], [0], [0]>} : vector<2x8x8xf32>, vector<2x8x8xf32>, vector<2x8x8xf32> -> vector<2x8x8xf32>
    %cst_45 = arith.constant 0.353553385 : f32
    %140 = vector.broadcast %cst_45 : f32 to vector<2x8x8xf32>
    %141 = arith.mulf %139, %140 : vector<2x8x8xf32>
    %cst_46 = arith.constant -1.000000e+30 : f32
    %142 = vector.shape_cast %13 : vector<1x8x8xi1> to vector<1x8x8xi1>
    %143 = vector.broadcast %142 : vector<1x8x8xi1> to vector<2x8x8xi1>
    %144 = vector.broadcast %cst_46 : f32 to vector<2x8x8xf32>
    %145 = arith.select %143, %141, %144 : vector<2x8x8xi1>, vector<2x8x8xf32>
    %cst_47 = arith.constant dense<0xFF800000> : vector<2x8xf32>
    %146 = vector.multi_reduction <maximumf>, %145, %cst_47 [2] : vector<2x8x8xf32> to vector<2x8xf32>
    %147 = vector.shape_cast %146 : vector<2x8xf32> to vector<2x8x1xf32>
    %148 = vector.broadcast %147 : vector<2x8x1xf32> to vector<2x8x8xf32>
    %149 = arith.subf %145, %148 : vector<2x8x8xf32>
    %150 = math.exp %149 : vector<2x8x8xf32>
    %cst_48 = arith.constant dense<0.000000e+00> : vector<2x8xf32>
    %151 = vector.multi_reduction <add>, %150, %cst_48 [2] : vector<2x8x8xf32> to vector<2x8xf32>
    %152 = vector.shape_cast %151 : vector<2x8xf32> to vector<2x8x1xf32>
    %153 = tpu.reciprocal %152 {approx = true} : vector<2x8x1xf32> -> vector<2x8x1xf32>
    %154 = vector.broadcast %153 : vector<2x8x1xf32> to vector<2x8x8xf32>
    %155 = arith.mulf %150, %154 : vector<2x8x8xf32>
    %cst_49 = arith.constant dense<0.000000e+00> : vector<2x8x8xf32>
    %156 = tpu.matmul %155, %138, %cst_49 {dimension_numbers = #tpu.dot_dimension_numbers<[2], [1], [1], [2], [0, 0, 0, 1, 1, 2], [0], [0]>} : vector<2x8x8xf32>, vector<2x8x8xf32>, vector<2x8x8xf32> -> vector<2x8x8xf32>
    %157 = vector.shape_cast %156 : vector<2x8x8xf32> to vector<16x8xf32>
    %158 = arith.truncf %157 : vector<16x8xf32> to vector<16x8xbf16>
    %159 = vector.extract_strided_slice %44 {offsets = [24, 0], sizes = [8, 32], strides = [1, 1]} : vector<32x32xbf16> to vector<8x32xbf16>
    %cst_50 = arith.constant dense<0.000000e+00> : vector<16x32xf32>
    %160 = tpu.matmul %158, %159, %cst_50 {dimension_numbers = #tpu.dot_dimension_numbers<[1], [0], [0], [1], [0, 0, 1, 1], [], []>} : vector<16x8xbf16>, vector<8x32xbf16>, vector<16x32xf32> -> vector<16x32xf32>
    %161 = arith.addf %132, %160 : vector<16x32xf32>
    %162 = arith.addf %9, %161 : vector<16x32xf32>
    %c4 = arith.constant 4 : index
    %c0_51 = arith.constant 0 : index
    %163 = vector.load %arg7[%c4, %c0_51] : memref<14x32xf32, #tpu.memory_space<vmem>>, vector<1x32xf32>
    %164 = vector.broadcast %163 : vector<1x32xf32> to vector<16x32xf32>
    %165 = arith.addf %162, %164 : vector<16x32xf32>
    %c2 = arith.constant 2 : index
    %c0_52 = arith.constant 0 : index
    %166 = vector.load %arg7[%c2, %c0_52] : memref<14x32xf32, #tpu.memory_space<vmem>>, vector<1x32xf32>
    %c3 = arith.constant 3 : index
    %c0_53 = arith.constant 0 : index
    %167 = vector.load %arg7[%c3, %c0_53] : memref<14x32xf32, #tpu.memory_space<vmem>>, vector<1x32xf32>
    %cst_54 = arith.constant dense<0.000000e+00> : vector<16xf32>
    %168 = vector.multi_reduction <add>, %165, %cst_54 [1] : vector<16x32xf32> to vector<16xf32>
    %169 = vector.shape_cast %168 : vector<16xf32> to vector<16x1xf32>
    %cst_55 = arith.constant 3.200000e+01 : f32
    %170 = vector.broadcast %cst_55 : f32 to vector<16x1xf32>
    %171 = arith.divf %169, %170 : vector<16x1xf32>
    %172 = vector.broadcast %171 : vector<16x1xf32> to vector<16x32xf32>
    %173 = arith.subf %165, %172 : vector<16x32xf32>
    %174 = arith.mulf %173, %173 : vector<16x32xf32>
    %cst_56 = arith.constant dense<0.000000e+00> : vector<16xf32>
    %175 = vector.multi_reduction <add>, %174, %cst_56 [1] : vector<16x32xf32> to vector<16xf32>
    %176 = vector.shape_cast %175 : vector<16xf32> to vector<16x1xf32>
    %cst_57 = arith.constant 3.200000e+01 : f32
    %177 = vector.broadcast %cst_57 : f32 to vector<16x1xf32>
    %178 = arith.divf %176, %177 : vector<16x1xf32>
    %cst_58 = arith.constant 9.99999974E-6 : f32
    %179 = vector.broadcast %cst_58 : f32 to vector<16x1xf32>
    %180 = arith.addf %178, %179 : vector<16x1xf32>
    %181 = math.rsqrt %180 : vector<16x1xf32>
    %182 = vector.broadcast %181 : vector<16x1xf32> to vector<16x32xf32>
    %183 = arith.mulf %173, %182 : vector<16x32xf32>
    %184 = vector.broadcast %166 : vector<1x32xf32> to vector<16x32xf32>
    %185 = arith.mulf %183, %184 : vector<16x32xf32>
    %186 = vector.broadcast %167 : vector<1x32xf32> to vector<16x32xf32>
    %187 = arith.addf %185, %186 : vector<16x32xf32>
    %188 = arith.truncf %187 : vector<16x32xf32> to vector<16x32xbf16>
    %c0_59 = arith.constant 0 : index
    %c0_60 = arith.constant 0 : index
    %c0_61 = arith.constant 0 : index
    %189 = vector.load %arg5[%c0_59, %c0_60, %c0_61] : memref<2x32x128xbf16, #tpu.memory_space<vmem>>, vector<1x32x128xbf16>
    %190 = vector.shape_cast %189 : vector<1x32x128xbf16> to vector<32x128xbf16>
    %cst_62 = arith.constant dense<0.000000e+00> : vector<16x128xf32>
    %191 = tpu.matmul %188, %190, %cst_62 {dimension_numbers = #tpu.dot_dimension_numbers<[1], [0], [0], [1], [0, 0, 1, 1], [], []>} : vector<16x32xbf16>, vector<32x128xbf16>, vector<16x128xf32> -> vector<16x128xf32>
    %c0_63 = arith.constant 0 : index
    %c0_64 = arith.constant 0 : index
    %192 = vector.load %arg9[%c0_63, %c0_64] : memref<2x128xf32, #tpu.memory_space<vmem>>, vector<1x128xf32>
    %193 = vector.broadcast %192 : vector<1x128xf32> to vector<16x128xf32>
    %194 = arith.addf %191, %193 : vector<16x128xf32>
    %cst_65 = arith.constant -1.702000e+00 : f32
    %195 = vector.broadcast %cst_65 : f32 to vector<16x128xf32>
    %196 = arith.mulf %195, %194 : vector<16x128xf32>
    %197 = math.exp %196 : vector<16x128xf32>
    %cst_66 = arith.constant 1.000000e+00 : f32
    %198 = vector.broadcast %cst_66 : f32 to vector<16x128xf32>
    %199 = arith.addf %198, %197 : vector<16x128xf32>
    %200 = tpu.reciprocal %199 {approx = true} : vector<16x128xf32> -> vector<16x128xf32>
    %201 = arith.mulf %194, %200 : vector<16x128xf32>
    %202 = arith.truncf %201 : vector<16x128xf32> to vector<16x128xbf16>
    %c0_67 = arith.constant 0 : index
    %c0_68 = arith.constant 0 : index
    %c0_69 = arith.constant 0 : index
    %203 = vector.load %arg6[%c0_67, %c0_68, %c0_69] : memref<2x128x32xbf16, #tpu.memory_space<vmem>>, vector<1x128x32xbf16>
    %204 = vector.shape_cast %203 : vector<1x128x32xbf16> to vector<128x32xbf16>
    %cst_70 = arith.constant dense<0.000000e+00> : vector<16x32xf32>
    %205 = tpu.matmul %202, %204, %cst_70 {dimension_numbers = #tpu.dot_dimension_numbers<[1], [0], [0], [1], [0, 0, 1, 1], [], []>} : vector<16x128xbf16>, vector<128x32xbf16>, vector<16x32xf32> -> vector<16x32xf32>
    %206 = arith.addf %165, %205 : vector<16x32xf32>
    %c5 = arith.constant 5 : index
    %c0_71 = arith.constant 0 : index
    %207 = vector.load %arg7[%c5, %c0_71] : memref<14x32xf32, #tpu.memory_space<vmem>>, vector<1x32xf32>
    %208 = vector.broadcast %207 : vector<1x32xf32> to vector<16x32xf32>
    %209 = arith.addf %206, %208 : vector<16x32xf32>
    %c6 = arith.constant 6 : index
    %c0_72 = arith.constant 0 : index
    %210 = vector.load %arg7[%c6, %c0_72] : memref<14x32xf32, #tpu.memory_space<vmem>>, vector<1x32xf32>
    %c7 = arith.constant 7 : index
    %c0_73 = arith.constant 0 : index
    %211 = vector.load %arg7[%c7, %c0_73] : memref<14x32xf32, #tpu.memory_space<vmem>>, vector<1x32xf32>
    %cst_74 = arith.constant dense<0.000000e+00> : vector<16xf32>
    %212 = vector.multi_reduction <add>, %209, %cst_74 [1] : vector<16x32xf32> to vector<16xf32>
    %213 = vector.shape_cast %212 : vector<16xf32> to vector<16x1xf32>
    %cst_75 = arith.constant 3.200000e+01 : f32
    %214 = vector.broadcast %cst_75 : f32 to vector<16x1xf32>
    %215 = arith.divf %213, %214 : vector<16x1xf32>
    %216 = vector.broadcast %215 : vector<16x1xf32> to vector<16x32xf32>
    %217 = arith.subf %209, %216 : vector<16x32xf32>
    %218 = arith.mulf %217, %217 : vector<16x32xf32>
    %cst_76 = arith.constant dense<0.000000e+00> : vector<16xf32>
    %219 = vector.multi_reduction <add>, %218, %cst_76 [1] : vector<16x32xf32> to vector<16xf32>
    %220 = vector.shape_cast %219 : vector<16xf32> to vector<16x1xf32>
    %cst_77 = arith.constant 3.200000e+01 : f32
    %221 = vector.broadcast %cst_77 : f32 to vector<16x1xf32>
    %222 = arith.divf %220, %221 : vector<16x1xf32>
    %cst_78 = arith.constant 9.99999974E-6 : f32
    %223 = vector.broadcast %cst_78 : f32 to vector<16x1xf32>
    %224 = arith.addf %222, %223 : vector<16x1xf32>
    %225 = math.rsqrt %224 : vector<16x1xf32>
    %226 = vector.broadcast %225 : vector<16x1xf32> to vector<16x32xf32>
    %227 = arith.mulf %217, %226 : vector<16x32xf32>
    %228 = vector.broadcast %210 : vector<1x32xf32> to vector<16x32xf32>
    %229 = arith.mulf %227, %228 : vector<16x32xf32>
    %230 = vector.broadcast %211 : vector<1x32xf32> to vector<16x32xf32>
    %231 = arith.addf %229, %230 : vector<16x32xf32>
    %232 = arith.truncf %231 : vector<16x32xf32> to vector<16x32xbf16>
    %c1_79 = arith.constant 1 : index
    %c0_80 = arith.constant 0 : index
    %c0_81 = arith.constant 0 : index
    %233 = vector.load %arg3[%c1_79, %c0_80, %c0_81] : memref<2x32x96xbf16, #tpu.memory_space<vmem>>, vector<1x32x96xbf16>
    %234 = vector.shape_cast %233 : vector<1x32x96xbf16> to vector<32x96xbf16>
    %cst_82 = arith.constant dense<0.000000e+00> : vector<16x96xf32>
    %235 = tpu.matmul %232, %234, %cst_82 {dimension_numbers = #tpu.dot_dimension_numbers<[1], [0], [0], [1], [0, 0, 1, 1], [], []>} : vector<16x32xbf16>, vector<32x96xbf16>, vector<16x96xf32> -> vector<16x96xf32>
    %c1_83 = arith.constant 1 : index
    %c0_84 = arith.constant 0 : index
    %236 = vector.load %arg8[%c1_83, %c0_84] : memref<2x96xf32, #tpu.memory_space<vmem>>, vector<1x96xf32>
    %237 = vector.broadcast %236 : vector<1x96xf32> to vector<16x96xf32>
    %238 = arith.addf %235, %237 : vector<16x96xf32>
    %c1_85 = arith.constant 1 : index
    %c0_86 = arith.constant 0 : index
    %c0_87 = arith.constant 0 : index
    %239 = vector.load %arg4[%c1_85, %c0_86, %c0_87] : memref<2x32x32xbf16, #tpu.memory_space<vmem>>, vector<1x32x32xbf16>
    %240 = vector.shape_cast %239 : vector<1x32x32xbf16> to vector<32x32xbf16>
    %cst_88 = arith.constant 0.000000e+00 : f32
    %241 = vector.broadcast %cst_88 : f32 to vector<16x32xf32>
    %242 = vector.extract_strided_slice %238 {offsets = [0, 0], sizes = [16, 8], strides = [1, 1]} : vector<16x96xf32> to vector<16x8xf32>
    %243 = vector.shape_cast %242 : vector<16x8xf32> to vector<2x8x8xf32>
    %244 = vector.extract_strided_slice %238 {offsets = [0, 32], sizes = [16, 8], strides = [1, 1]} : vector<16x96xf32> to vector<16x8xf32>
    %245 = vector.shape_cast %244 : vector<16x8xf32> to vector<2x8x8xf32>
    %246 = vector.extract_strided_slice %238 {offsets = [0, 64], sizes = [16, 8], strides = [1, 1]} : vector<16x96xf32> to vector<16x8xf32>
    %247 = vector.shape_cast %246 : vector<16x8xf32> to vector<2x8x8xf32>
    %cst_89 = arith.constant dense<0.000000e+00> : vector<2x8x8xf32>
    %248 = tpu.matmul %243, %245, %cst_89 {dimension_numbers = #tpu.dot_dimension_numbers<[2], [2], [1], [1], [0, 0, 0, 1, 1, 1], [0], [0]>} : vector<2x8x8xf32>, vector<2x8x8xf32>, vector<2x8x8xf32> -> vector<2x8x8xf32>
    %cst_90 = arith.constant 0.353553385 : f32
    %249 = vector.broadcast %cst_90 : f32 to vector<2x8x8xf32>
    %250 = arith.mulf %248, %249 : vector<2x8x8xf32>
    %cst_91 = arith.constant -1.000000e+30 : f32
    %251 = vector.shape_cast %13 : vector<1x8x8xi1> to vector<1x8x8xi1>
    %252 = vector.broadcast %251 : vector<1x8x8xi1> to vector<2x8x8xi1>
    %253 = vector.broadcast %cst_91 : f32 to vector<2x8x8xf32>
    %254 = arith.select %252, %250, %253 : vector<2x8x8xi1>, vector<2x8x8xf32>
    %cst_92 = arith.constant dense<0xFF800000> : vector<2x8xf32>
    %255 = vector.multi_reduction <maximumf>, %254, %cst_92 [2] : vector<2x8x8xf32> to vector<2x8xf32>
    %256 = vector.shape_cast %255 : vector<2x8xf32> to vector<2x8x1xf32>
    %257 = vector.broadcast %256 : vector<2x8x1xf32> to vector<2x8x8xf32>
    %258 = arith.subf %254, %257 : vector<2x8x8xf32>
    %259 = math.exp %258 : vector<2x8x8xf32>
    %cst_93 = arith.constant dense<0.000000e+00> : vector<2x8xf32>
    %260 = vector.multi_reduction <add>, %259, %cst_93 [2] : vector<2x8x8xf32> to vector<2x8xf32>
    %261 = vector.shape_cast %260 : vector<2x8xf32> to vector<2x8x1xf32>
    %262 = tpu.reciprocal %261 {approx = true} : vector<2x8x1xf32> -> vector<2x8x1xf32>
    %263 = vector.broadcast %262 : vector<2x8x1xf32> to vector<2x8x8xf32>
    %264 = arith.mulf %259, %263 : vector<2x8x8xf32>
    %cst_94 = arith.constant dense<0.000000e+00> : vector<2x8x8xf32>
    %265 = tpu.matmul %264, %247, %cst_94 {dimension_numbers = #tpu.dot_dimension_numbers<[2], [1], [1], [2], [0, 0, 0, 1, 1, 2], [0], [0]>} : vector<2x8x8xf32>, vector<2x8x8xf32>, vector<2x8x8xf32> -> vector<2x8x8xf32>
    %266 = vector.shape_cast %265 : vector<2x8x8xf32> to vector<16x8xf32>
    %267 = arith.truncf %266 : vector<16x8xf32> to vector<16x8xbf16>
    %268 = vector.extract_strided_slice %240 {offsets = [0, 0], sizes = [8, 32], strides = [1, 1]} : vector<32x32xbf16> to vector<8x32xbf16>
    %cst_95 = arith.constant dense<0.000000e+00> : vector<16x32xf32>
    %269 = tpu.matmul %267, %268, %cst_95 {dimension_numbers = #tpu.dot_dimension_numbers<[1], [0], [0], [1], [0, 0, 1, 1], [], []>} : vector<16x8xbf16>, vector<8x32xbf16>, vector<16x32xf32> -> vector<16x32xf32>
    %270 = arith.addf %241, %269 : vector<16x32xf32>
    %271 = vector.extract_strided_slice %238 {offsets = [0, 8], sizes = [16, 8], strides = [1, 1]} : vector<16x96xf32> to vector<16x8xf32>
    %272 = vector.shape_cast %271 : vector<16x8xf32> to vector<2x8x8xf32>
    %273 = vector.extract_strided_slice %238 {offsets = [0, 40], sizes = [16, 8], strides = [1, 1]} : vector<16x96xf32> to vector<16x8xf32>
    %274 = vector.shape_cast %273 : vector<16x8xf32> to vector<2x8x8xf32>
    %275 = vector.extract_strided_slice %238 {offsets = [0, 72], sizes = [16, 8], strides = [1, 1]} : vector<16x96xf32> to vector<16x8xf32>
    %276 = vector.shape_cast %275 : vector<16x8xf32> to vector<2x8x8xf32>
    %cst_96 = arith.constant dense<0.000000e+00> : vector<2x8x8xf32>
    %277 = tpu.matmul %272, %274, %cst_96 {dimension_numbers = #tpu.dot_dimension_numbers<[2], [2], [1], [1], [0, 0, 0, 1, 1, 1], [0], [0]>} : vector<2x8x8xf32>, vector<2x8x8xf32>, vector<2x8x8xf32> -> vector<2x8x8xf32>
    %cst_97 = arith.constant 0.353553385 : f32
    %278 = vector.broadcast %cst_97 : f32 to vector<2x8x8xf32>
    %279 = arith.mulf %277, %278 : vector<2x8x8xf32>
    %cst_98 = arith.constant -1.000000e+30 : f32
    %280 = vector.shape_cast %13 : vector<1x8x8xi1> to vector<1x8x8xi1>
    %281 = vector.broadcast %280 : vector<1x8x8xi1> to vector<2x8x8xi1>
    %282 = vector.broadcast %cst_98 : f32 to vector<2x8x8xf32>
    %283 = arith.select %281, %279, %282 : vector<2x8x8xi1>, vector<2x8x8xf32>
    %cst_99 = arith.constant dense<0xFF800000> : vector<2x8xf32>
    %284 = vector.multi_reduction <maximumf>, %283, %cst_99 [2] : vector<2x8x8xf32> to vector<2x8xf32>
    %285 = vector.shape_cast %284 : vector<2x8xf32> to vector<2x8x1xf32>
    %286 = vector.broadcast %285 : vector<2x8x1xf32> to vector<2x8x8xf32>
    %287 = arith.subf %283, %286 : vector<2x8x8xf32>
    %288 = math.exp %287 : vector<2x8x8xf32>
    %cst_100 = arith.constant dense<0.000000e+00> : vector<2x8xf32>
    %289 = vector.multi_reduction <add>, %288, %cst_100 [2] : vector<2x8x8xf32> to vector<2x8xf32>
    %290 = vector.shape_cast %289 : vector<2x8xf32> to vector<2x8x1xf32>
    %291 = tpu.reciprocal %290 {approx = true} : vector<2x8x1xf32> -> vector<2x8x1xf32>
    %292 = vector.broadcast %291 : vector<2x8x1xf32> to vector<2x8x8xf32>
    %293 = arith.mulf %288, %292 : vector<2x8x8xf32>
    %cst_101 = arith.constant dense<0.000000e+00> : vector<2x8x8xf32>
    %294 = tpu.matmul %293, %276, %cst_101 {dimension_numbers = #tpu.dot_dimension_numbers<[2], [1], [1], [2], [0, 0, 0, 1, 1, 2], [0], [0]>} : vector<2x8x8xf32>, vector<2x8x8xf32>, vector<2x8x8xf32> -> vector<2x8x8xf32>
    %295 = vector.shape_cast %294 : vector<2x8x8xf32> to vector<16x8xf32>
    %296 = arith.truncf %295 : vector<16x8xf32> to vector<16x8xbf16>
    %297 = vector.extract_strided_slice %240 {offsets = [8, 0], sizes = [8, 32], strides = [1, 1]} : vector<32x32xbf16> to vector<8x32xbf16>
    %cst_102 = arith.constant dense<0.000000e+00> : vector<16x32xf32>
    %298 = tpu.matmul %296, %297, %cst_102 {dimension_numbers = #tpu.dot_dimension_numbers<[1], [0], [0], [1], [0, 0, 1, 1], [], []>} : vector<16x8xbf16>, vector<8x32xbf16>, vector<16x32xf32> -> vector<16x32xf32>
    %299 = arith.addf %270, %298 : vector<16x32xf32>
    %300 = vector.extract_strided_slice %238 {offsets = [0, 16], sizes = [16, 8], strides = [1, 1]} : vector<16x96xf32> to vector<16x8xf32>
    %301 = vector.shape_cast %300 : vector<16x8xf32> to vector<2x8x8xf32>
    %302 = vector.extract_strided_slice %238 {offsets = [0, 48], sizes = [16, 8], strides = [1, 1]} : vector<16x96xf32> to vector<16x8xf32>
    %303 = vector.shape_cast %302 : vector<16x8xf32> to vector<2x8x8xf32>
    %304 = vector.extract_strided_slice %238 {offsets = [0, 80], sizes = [16, 8], strides = [1, 1]} : vector<16x96xf32> to vector<16x8xf32>
    %305 = vector.shape_cast %304 : vector<16x8xf32> to vector<2x8x8xf32>
    %cst_103 = arith.constant dense<0.000000e+00> : vector<2x8x8xf32>
    %306 = tpu.matmul %301, %303, %cst_103 {dimension_numbers = #tpu.dot_dimension_numbers<[2], [2], [1], [1], [0, 0, 0, 1, 1, 1], [0], [0]>} : vector<2x8x8xf32>, vector<2x8x8xf32>, vector<2x8x8xf32> -> vector<2x8x8xf32>
    %cst_104 = arith.constant 0.353553385 : f32
    %307 = vector.broadcast %cst_104 : f32 to vector<2x8x8xf32>
    %308 = arith.mulf %306, %307 : vector<2x8x8xf32>
    %cst_105 = arith.constant -1.000000e+30 : f32
    %309 = vector.shape_cast %13 : vector<1x8x8xi1> to vector<1x8x8xi1>
    %310 = vector.broadcast %309 : vector<1x8x8xi1> to vector<2x8x8xi1>
    %311 = vector.broadcast %cst_105 : f32 to vector<2x8x8xf32>
    %312 = arith.select %310, %308, %311 : vector<2x8x8xi1>, vector<2x8x8xf32>
    %cst_106 = arith.constant dense<0xFF800000> : vector<2x8xf32>
    %313 = vector.multi_reduction <maximumf>, %312, %cst_106 [2] : vector<2x8x8xf32> to vector<2x8xf32>
    %314 = vector.shape_cast %313 : vector<2x8xf32> to vector<2x8x1xf32>
    %315 = vector.broadcast %314 : vector<2x8x1xf32> to vector<2x8x8xf32>
    %316 = arith.subf %312, %315 : vector<2x8x8xf32>
    %317 = math.exp %316 : vector<2x8x8xf32>
    %cst_107 = arith.constant dense<0.000000e+00> : vector<2x8xf32>
    %318 = vector.multi_reduction <add>, %317, %cst_107 [2] : vector<2x8x8xf32> to vector<2x8xf32>
    %319 = vector.shape_cast %318 : vector<2x8xf32> to vector<2x8x1xf32>
    %320 = tpu.reciprocal %319 {approx = true} : vector<2x8x1xf32> -> vector<2x8x1xf32>
    %321 = vector.broadcast %320 : vector<2x8x1xf32> to vector<2x8x8xf32>
    %322 = arith.mulf %317, %321 : vector<2x8x8xf32>
    %cst_108 = arith.constant dense<0.000000e+00> : vector<2x8x8xf32>
    %323 = tpu.matmul %322, %305, %cst_108 {dimension_numbers = #tpu.dot_dimension_numbers<[2], [1], [1], [2], [0, 0, 0, 1, 1, 2], [0], [0]>} : vector<2x8x8xf32>, vector<2x8x8xf32>, vector<2x8x8xf32> -> vector<2x8x8xf32>
    %324 = vector.shape_cast %323 : vector<2x8x8xf32> to vector<16x8xf32>
    %325 = arith.truncf %324 : vector<16x8xf32> to vector<16x8xbf16>
    %326 = vector.extract_strided_slice %240 {offsets = [16, 0], sizes = [8, 32], strides = [1, 1]} : vector<32x32xbf16> to vector<8x32xbf16>
    %cst_109 = arith.constant dense<0.000000e+00> : vector<16x32xf32>
    %327 = tpu.matmul %325, %326, %cst_109 {dimension_numbers = #tpu.dot_dimension_numbers<[1], [0], [0], [1], [0, 0, 1, 1], [], []>} : vector<16x8xbf16>, vector<8x32xbf16>, vector<16x32xf32> -> vector<16x32xf32>
    %328 = arith.addf %299, %327 : vector<16x32xf32>
    %329 = vector.extract_strided_slice %238 {offsets = [0, 24], sizes = [16, 8], strides = [1, 1]} : vector<16x96xf32> to vector<16x8xf32>
    %330 = vector.shape_cast %329 : vector<16x8xf32> to vector<2x8x8xf32>
    %331 = vector.extract_strided_slice %238 {offsets = [0, 56], sizes = [16, 8], strides = [1, 1]} : vector<16x96xf32> to vector<16x8xf32>
    %332 = vector.shape_cast %331 : vector<16x8xf32> to vector<2x8x8xf32>
    %333 = vector.extract_strided_slice %238 {offsets = [0, 88], sizes = [16, 8], strides = [1, 1]} : vector<16x96xf32> to vector<16x8xf32>
    %334 = vector.shape_cast %333 : vector<16x8xf32> to vector<2x8x8xf32>
    %cst_110 = arith.constant dense<0.000000e+00> : vector<2x8x8xf32>
    %335 = tpu.matmul %330, %332, %cst_110 {dimension_numbers = #tpu.dot_dimension_numbers<[2], [2], [1], [1], [0, 0, 0, 1, 1, 1], [0], [0]>} : vector<2x8x8xf32>, vector<2x8x8xf32>, vector<2x8x8xf32> -> vector<2x8x8xf32>
    %cst_111 = arith.constant 0.353553385 : f32
    %336 = vector.broadcast %cst_111 : f32 to vector<2x8x8xf32>
    %337 = arith.mulf %335, %336 : vector<2x8x8xf32>
    %cst_112 = arith.constant -1.000000e+30 : f32
    %338 = vector.shape_cast %13 : vector<1x8x8xi1> to vector<1x8x8xi1>
    %339 = vector.broadcast %338 : vector<1x8x8xi1> to vector<2x8x8xi1>
    %340 = vector.broadcast %cst_112 : f32 to vector<2x8x8xf32>
    %341 = arith.select %339, %337, %340 : vector<2x8x8xi1>, vector<2x8x8xf32>
    %cst_113 = arith.constant dense<0xFF800000> : vector<2x8xf32>
    %342 = vector.multi_reduction <maximumf>, %341, %cst_113 [2] : vector<2x8x8xf32> to vector<2x8xf32>
    %343 = vector.shape_cast %342 : vector<2x8xf32> to vector<2x8x1xf32>
    %344 = vector.broadcast %343 : vector<2x8x1xf32> to vector<2x8x8xf32>
    %345 = arith.subf %341, %344 : vector<2x8x8xf32>
    %346 = math.exp %345 : vector<2x8x8xf32>
    %cst_114 = arith.constant dense<0.000000e+00> : vector<2x8xf32>
    %347 = vector.multi_reduction <add>, %346, %cst_114 [2] : vector<2x8x8xf32> to vector<2x8xf32>
    %348 = vector.shape_cast %347 : vector<2x8xf32> to vector<2x8x1xf32>
    %349 = tpu.reciprocal %348 {approx = true} : vector<2x8x1xf32> -> vector<2x8x1xf32>
    %350 = vector.broadcast %349 : vector<2x8x1xf32> to vector<2x8x8xf32>
    %351 = arith.mulf %346, %350 : vector<2x8x8xf32>
    %cst_115 = arith.constant dense<0.000000e+00> : vector<2x8x8xf32>
    %352 = tpu.matmul %351, %334, %cst_115 {dimension_numbers = #tpu.dot_dimension_numbers<[2], [1], [1], [2], [0, 0, 0, 1, 1, 2], [0], [0]>} : vector<2x8x8xf32>, vector<2x8x8xf32>, vector<2x8x8xf32> -> vector<2x8x8xf32>
    %353 = vector.shape_cast %352 : vector<2x8x8xf32> to vector<16x8xf32>
    %354 = arith.truncf %353 : vector<16x8xf32> to vector<16x8xbf16>
    %355 = vector.extract_strided_slice %240 {offsets = [24, 0], sizes = [8, 32], strides = [1, 1]} : vector<32x32xbf16> to vector<8x32xbf16>
    %cst_116 = arith.constant dense<0.000000e+00> : vector<16x32xf32>
    %356 = tpu.matmul %354, %355, %cst_116 {dimension_numbers = #tpu.dot_dimension_numbers<[1], [0], [0], [1], [0, 0, 1, 1], [], []>} : vector<16x8xbf16>, vector<8x32xbf16>, vector<16x32xf32> -> vector<16x32xf32>
    %357 = arith.addf %328, %356 : vector<16x32xf32>
    %358 = arith.addf %209, %357 : vector<16x32xf32>
    %c10 = arith.constant 10 : index
    %c0_117 = arith.constant 0 : index
    %359 = vector.load %arg7[%c10, %c0_117] : memref<14x32xf32, #tpu.memory_space<vmem>>, vector<1x32xf32>
    %360 = vector.broadcast %359 : vector<1x32xf32> to vector<16x32xf32>
    %361 = arith.addf %358, %360 : vector<16x32xf32>
    %c8 = arith.constant 8 : index
    %c0_118 = arith.constant 0 : index
    %362 = vector.load %arg7[%c8, %c0_118] : memref<14x32xf32, #tpu.memory_space<vmem>>, vector<1x32xf32>
    %c9 = arith.constant 9 : index
    %c0_119 = arith.constant 0 : index
    %363 = vector.load %arg7[%c9, %c0_119] : memref<14x32xf32, #tpu.memory_space<vmem>>, vector<1x32xf32>
    %cst_120 = arith.constant dense<0.000000e+00> : vector<16xf32>
    %364 = vector.multi_reduction <add>, %361, %cst_120 [1] : vector<16x32xf32> to vector<16xf32>
    %365 = vector.shape_cast %364 : vector<16xf32> to vector<16x1xf32>
    %cst_121 = arith.constant 3.200000e+01 : f32
    %366 = vector.broadcast %cst_121 : f32 to vector<16x1xf32>
    %367 = arith.divf %365, %366 : vector<16x1xf32>
    %368 = vector.broadcast %367 : vector<16x1xf32> to vector<16x32xf32>
    %369 = arith.subf %361, %368 : vector<16x32xf32>
    %370 = arith.mulf %369, %369 : vector<16x32xf32>
    %cst_122 = arith.constant dense<0.000000e+00> : vector<16xf32>
    %371 = vector.multi_reduction <add>, %370, %cst_122 [1] : vector<16x32xf32> to vector<16xf32>
    %372 = vector.shape_cast %371 : vector<16xf32> to vector<16x1xf32>
    %cst_123 = arith.constant 3.200000e+01 : f32
    %373 = vector.broadcast %cst_123 : f32 to vector<16x1xf32>
    %374 = arith.divf %372, %373 : vector<16x1xf32>
    %cst_124 = arith.constant 9.99999974E-6 : f32
    %375 = vector.broadcast %cst_124 : f32 to vector<16x1xf32>
    %376 = arith.addf %374, %375 : vector<16x1xf32>
    %377 = math.rsqrt %376 : vector<16x1xf32>
    %378 = vector.broadcast %377 : vector<16x1xf32> to vector<16x32xf32>
    %379 = arith.mulf %369, %378 : vector<16x32xf32>
    %380 = vector.broadcast %362 : vector<1x32xf32> to vector<16x32xf32>
    %381 = arith.mulf %379, %380 : vector<16x32xf32>
    %382 = vector.broadcast %363 : vector<1x32xf32> to vector<16x32xf32>
    %383 = arith.addf %381, %382 : vector<16x32xf32>
    %384 = arith.truncf %383 : vector<16x32xf32> to vector<16x32xbf16>
    %c1_125 = arith.constant 1 : index
    %c0_126 = arith.constant 0 : index
    %c0_127 = arith.constant 0 : index
    %385 = vector.load %arg5[%c1_125, %c0_126, %c0_127] : memref<2x32x128xbf16, #tpu.memory_space<vmem>>, vector<1x32x128xbf16>
    %386 = vector.shape_cast %385 : vector<1x32x128xbf16> to vector<32x128xbf16>
    %cst_128 = arith.constant dense<0.000000e+00> : vector<16x128xf32>
    %387 = tpu.matmul %384, %386, %cst_128 {dimension_numbers = #tpu.dot_dimension_numbers<[1], [0], [0], [1], [0, 0, 1, 1], [], []>} : vector<16x32xbf16>, vector<32x128xbf16>, vector<16x128xf32> -> vector<16x128xf32>
    %c1_129 = arith.constant 1 : index
    %c0_130 = arith.constant 0 : index
    %388 = vector.load %arg9[%c1_129, %c0_130] : memref<2x128xf32, #tpu.memory_space<vmem>>, vector<1x128xf32>
    %389 = vector.broadcast %388 : vector<1x128xf32> to vector<16x128xf32>
    %390 = arith.addf %387, %389 : vector<16x128xf32>
    %cst_131 = arith.constant -1.702000e+00 : f32
    %391 = vector.broadcast %cst_131 : f32 to vector<16x128xf32>
    %392 = arith.mulf %391, %390 : vector<16x128xf32>
    %393 = math.exp %392 : vector<16x128xf32>
    %cst_132 = arith.constant 1.000000e+00 : f32
    %394 = vector.broadcast %cst_132 : f32 to vector<16x128xf32>
    %395 = arith.addf %394, %393 : vector<16x128xf32>
    %396 = tpu.reciprocal %395 {approx = true} : vector<16x128xf32> -> vector<16x128xf32>
    %397 = arith.mulf %390, %396 : vector<16x128xf32>
    %398 = arith.truncf %397 : vector<16x128xf32> to vector<16x128xbf16>
    %c1_133 = arith.constant 1 : index
    %c0_134 = arith.constant 0 : index
    %c0_135 = arith.constant 0 : index
    %399 = vector.load %arg6[%c1_133, %c0_134, %c0_135] : memref<2x128x32xbf16, #tpu.memory_space<vmem>>, vector<1x128x32xbf16>
    %400 = vector.shape_cast %399 : vector<1x128x32xbf16> to vector<128x32xbf16>
    %cst_136 = arith.constant dense<0.000000e+00> : vector<16x32xf32>
    %401 = tpu.matmul %398, %400, %cst_136 {dimension_numbers = #tpu.dot_dimension_numbers<[1], [0], [0], [1], [0, 0, 1, 1], [], []>} : vector<16x128xbf16>, vector<128x32xbf16>, vector<16x32xf32> -> vector<16x32xf32>
    %402 = arith.addf %361, %401 : vector<16x32xf32>
    %c11 = arith.constant 11 : index
    %c0_137 = arith.constant 0 : index
    %403 = vector.load %arg7[%c11, %c0_137] : memref<14x32xf32, #tpu.memory_space<vmem>>, vector<1x32xf32>
    %404 = vector.broadcast %403 : vector<1x32xf32> to vector<16x32xf32>
    %405 = arith.addf %402, %404 : vector<16x32xf32>
    %c12 = arith.constant 12 : index
    %c0_138 = arith.constant 0 : index
    %406 = vector.load %arg7[%c12, %c0_138] : memref<14x32xf32, #tpu.memory_space<vmem>>, vector<1x32xf32>
    %c13 = arith.constant 13 : index
    %c0_139 = arith.constant 0 : index
    %407 = vector.load %arg7[%c13, %c0_139] : memref<14x32xf32, #tpu.memory_space<vmem>>, vector<1x32xf32>
    %cst_140 = arith.constant dense<0.000000e+00> : vector<16xf32>
    %408 = vector.multi_reduction <add>, %405, %cst_140 [1] : vector<16x32xf32> to vector<16xf32>
    %409 = vector.shape_cast %408 : vector<16xf32> to vector<16x1xf32>
    %cst_141 = arith.constant 3.200000e+01 : f32
    %410 = vector.broadcast %cst_141 : f32 to vector<16x1xf32>
    %411 = arith.divf %409, %410 : vector<16x1xf32>
    %412 = vector.broadcast %411 : vector<16x1xf32> to vector<16x32xf32>
    %413 = arith.subf %405, %412 : vector<16x32xf32>
    %414 = arith.mulf %413, %413 : vector<16x32xf32>
    %cst_142 = arith.constant dense<0.000000e+00> : vector<16xf32>
    %415 = vector.multi_reduction <add>, %414, %cst_142 [1] : vector<16x32xf32> to vector<16xf32>
    %416 = vector.shape_cast %415 : vector<16xf32> to vector<16x1xf32>
    %cst_143 = arith.constant 3.200000e+01 : f32
    %417 = vector.broadcast %cst_143 : f32 to vector<16x1xf32>
    %418 = arith.divf %416, %417 : vector<16x1xf32>
    %cst_144 = arith.constant 9.99999974E-6 : f32
    %419 = vector.broadcast %cst_144 : f32 to vector<16x1xf32>
    %420 = arith.addf %418, %419 : vector<16x1xf32>
    %421 = math.rsqrt %420 : vector<16x1xf32>
    %422 = vector.broadcast %421 : vector<16x1xf32> to vector<16x32xf32>
    %423 = arith.mulf %413, %422 : vector<16x32xf32>
    %424 = vector.broadcast %406 : vector<1x32xf32> to vector<16x32xf32>
    %425 = arith.mulf %423, %424 : vector<16x32xf32>
    %426 = vector.broadcast %407 : vector<1x32xf32> to vector<16x32xf32>
    %427 = arith.addf %425, %426 : vector<16x32xf32>
    %428 = vector.shape_cast %427 : vector<16x32xf32> to vector<2x8x32xf32>
    %c0_145 = arith.constant 0 : index
    %c0_146 = arith.constant 0 : index
    %c0_147 = arith.constant 0 : index
    %429 = vector.load %arg10[%c0_145, %c0_146, %c0_147] : memref<2x8x32xf32, #tpu.memory_space<vmem>>, vector<2x8x32xf32>
    tpu.vector_store %arg10[%c0_145, %c0_146, %c0_147], %428 {strides = array<i32>} : memref<2x8x32xf32, #tpu.memory_space<vmem>>, vector<2x8x32xf32>,
    return
  }
}

</mosaic_0001>

<bundles_post_ra>
// kernel: tpu_custom_call.1
= control target key start
LH: loop header
LB: loop body
LE: loop exit
PB: predicated region body
PF: predicated region fallthrough
CT: control target
= control target key end

     0   :  { %v4757_v2 = vmov 0   ;;  %s5534_s0 = inlined_call_operand.vmem [shape: s32[16,1], index: 0, kind: input, shape index: {}]   ;;  %s5535_s1 = inlined_call_operand.vmem [shape: f32[128,32], index: 1, kind: input, shape index: {}]   ;;  %s5536_s2 = inlined_call_operand.vmem [shape: f32[16,32], index: 2, kind: input, shape index: {}]   ;;  %s5537_s3 = inlined_call_operand.vmem [shape: bf16[2,32,96], index: 3, kind: input, shape index: {}]   ;;  %s5538_s4 = inlined_call_operand.vmem [shape: bf16[2,32,32], index: 4, kind: input, shape index: {}]   ;;  %s5539_s5 = inlined_call_operand.vmem [shape: bf16[2,32,128], index: 5, kind: input, shape index: {}]   ;;  %s5540_s6 = inlined_call_operand.vmem [shape: bf16[2,128,32], index: 6, kind: input, shape index: {}]   ;;  %s5541_s7 = inlined_call_operand.vmem [shape: f32[14,32], index: 7, kind: input, shape index: {}]   ;;  %s5542_s8 = inlined_call_operand.vmem [shape: f32[2,96], index: 8, kind: input, shape index: {}]   ;;  %s5543_s9 = inlined_call_operand.vmem [shape: f32[2,128], index: 9, kind: input, shape index: {}]   ;;  %s5544_s10 = inlined_call_operand.hbm [shape: f32[2,8,32], index: 10, kind: output, shape index: {}]  }
   0x1   :  { %v37_v0 = vld [vmem:[%s5534_s0] sm:$0xff]  ;;  %4608 = vset.pattern.permute.xlu0 %v4757_v2  ;;  %v54_v3 = vld [vmem:[%s5535_s1 + $0x8] sm:$0xff]  ;;  %v55_v4 = vld [vmem:[%s5535_s1 + $0x10] sm:$0xff] }
   0x2   :  { %v53_v1 = vld [vmem:[%s5535_s1] sm:$0xff]  ;;  %v56_v5 = vld [vmem:[%s5535_s1 + $0x18] sm:$0xff]  ;;  %42 = vperm.xlu0 %4608, %v37_v0   ;;  %v38_v8 = vld [vmem:[%s5534_s0 + $0x8] sm:$0xff] }
   0x3   :  { %v4558_v6 = vpack.c.bf16 %v54_v3, %v53_v1  ;;  %v4562_v7 = vpack.c.bf16 %v56_v5, %v55_v4  ;;  %v57_v9 = vld [vmem:[%s5535_s1 + $0x20] sm:$0xff]  ;;  %v58_v10 = vld [vmem:[%s5535_s1 + $0x28] sm:$0xff]  ;;  %v59_v11 = vld [vmem:[%s5535_s1 + $0x30] sm:$0xff] }
   0x4   :  { %v4566_v12 = vpack.c.bf16 %v58_v10, %v57_v9  ;;  %v60_v13 = vld [vmem:[%s5535_s1 + $0x38] sm:$0xff]  ;;  %v61_v14 = vld [vmem:[%s5535_s1 + $0x40] sm:$0xff]  ;;  %v62_v15 = vld [vmem:[%s5535_s1 + $0x48] sm:$0xff] }
   0x5   :  { %4559 = vmatprep.subr.bf16.mxu0 %v4558_v6  ;;  %v4570_v16 = vpack.c.bf16 %v60_v13, %v59_v11  ;;  %v63_v17 = vld [vmem:[%s5535_s1 + $0x50] sm:$0xff]  ;;  %v64_v18 = vld [vmem:[%s5535_s1 + $0x58] sm:$0xff]  ;;  %v4574_v19 = vpack.c.bf16 %v62_v15, %v61_v14  ;;  %v65_v20 = vld [vmem:[%s5535_s1 + $0x60] sm:$0xff] }
   0x6   :  { %4561 = vmatpush3.bf16.msra.mxu0 %v4558_v6  ;;  %45 = vperm.xlu0 %4608, %v38_v8   ;;  %v66_v21 = vld [vmem:[%s5535_s1 + $0x68] sm:$0xff]  ;;  %v4578_v22 = vpack.c.bf16 %v64_v18, %v63_v17 }
   0x7   :  { %4563 = vmatprep.subr.bf16.mxu0 %v4562_v7  ;;  %v4582_v23 = vpack.c.bf16 %v66_v21, %v65_v20 }
   0xa   :  { %4565 = vmatpush3.bf16.msra.mxu0 %v4562_v7 }
   0xb   :  { %4567 = vmatprep.subr.bf16.mxu0 %v4566_v12 }
   0xe   :  { %4569 = vmatpush3.bf16.msra.mxu0 %v4566_v12 }
   0xf   :  { %4571 = vmatprep.subr.bf16.mxu0 %v4570_v16 }
  0x12   :  { %4573 = vmatpush3.bf16.msra.mxu0 %v4570_v16 }
  0x13   :  { %4575 = vmatprep.subr.bf16.mxu0 %v4574_v19 }
  0x16   :  { %4577 = vmatpush3.bf16.msra.mxu0 %v4574_v19 }
  0x17   :  { %4579 = vmatprep.subr.bf16.mxu0 %v4578_v22 }
  0x18   :  { %15 = vsyncpa [#allocation3], 0  ;;  %v67_v24 = vld [vmem:[%s5535_s1 + $0x70] sm:$0xff]  ;;  %v68_v25 = vld [vmem:[%s5535_s1 + $0x78] sm:$0xff]  ;;  %v39_v27 = vlaneseq  ;;  %v4758_v30 = vmov 1.0   ;;  %vm151_vm2 = vcmask 261120  }
  0x19   :  { %v4586_v26 = vpack.c.bf16 %v68_v25, %v67_v24  ;;  %v69_v32 = vld [vmem:[%s5536_s2] sm:$0xff]  ;;  %v70_v34 = vld [vmem:[%s5536_s2 + $0x8] sm:$0xff]  ;;  %v4759_v51 = vmov 0.0   ;;  %vm4760_vm3 = vmmov 0   ;;  %s4761_s19 = smov 64   ;;  %s4762_s20 = smov 96  }
  0x1a   :  { %4581 = vmatpush3.bf16.msra.mxu0 %v4578_v22  ;;  %v4885_v28 = vand.u32 127, %v39_v27  ;;  %v4609_v50 = vld [vmem:[%s5537_s3] sm:$0xff]   ;;  %4278 = vmatprep.subr.bf16.mxu1 %v4759_v51  ;;  %v4610_v52 = vld [vmem:[%s5537_s3 + $0x8] sm:$0xff]   ;;  %vm264_vm4 = vcmask 64512   ;;  %v147_v16 = vshrl.u32 %v39_v27, 7  ;;  %s4763_s21 = smov 88  }
  0x1b   :  { %4583 = vmatprep.subr.bf16.mxu0 %v4582_v23  ;;  %4279 = vmatpush3.bf16.msra.mxu1 %v4609_v50  ;;  %v3985_v61 = vld [vmem:[%s5541_s7] ss:$0 sm:$0xff]  ;;  %v3986_v1 = vld [vmem:[%s5541_s7 + $0x1] ss:$0 sm:$0xff]  ;;  %s4764_s22 = smov 120   ;;  %s4765_s23 = smov 56  }
  0x1c   :  { %4282 = vmatprep.mubr.msk.bf16.mxu1 %vm4760_vm3, %v4759_v51  ;;  %4280 = vmatprep.subr.bf16.mxu1 %v4759_v51  ;;  %v3987_v6 = vld [vmem:[%s5542_s8] ss:$0 sm:$0xff]  ;;  %vm4958_vm5 = vcmp.le.s32.totalorder %v4885_v28, %v147_v16  ;;  %s4766_s24 = smov 80   ;;  %s4767_s25 = smov 112   ;;  %vm935_vm6 = vcmask 1043456  }
  0x1d   :  { %s4768_s29 = smov 72   ;;  %s4769_s30 = smov 104  }
  0x1e   :  { %4585 = vmatpush3.bf16.msra.mxu0 %v4582_v23  ;;  %s4770_s2 = smov 48   ;;  %s4771_s11 = smov 40  }
  0x1f   :  { %4587 = vmatprep.subr.bf16.mxu0 %v4586_v26  ;;  %4281 = vmatpush3.bf16.msra.mxu1 %v4610_v52  ;;  %s4772_s18 = smov [#allocation2]  }
  0x20   :  { %4286 = vmatprep.subr.mxu1 %v4759_v51  ;;  %s3970_s26 = sshll.u32 %s4772_s18, 4  ;;  %s3971_s26 = int_to_ptr.vmem [resolvable:$true] %s3970_s26 }
  0x21   :  { %s4733_s27 = scalar_lea.vmem %s3971_s26, 256  ;;  %p4738_p1 = scmp.lt.s32.totalorder %s3971_s26, %s3971_s26 }
  0x22   :  { %4589 = vmatpush3.bf16.msra.mxu0 %v4586_v26  ;;  %p4734_p0 = scmp.ne.s32.totalorder %s3971_s26, %s4733_s27  ;;  %p4739_p2 = scmp.lt.s32.totalorder %s4733_s27, %s4733_s27 }
  0x23   :  { %4321 = vmatprep.subr.mxu0 %v4759_v51 }
  0x24   :  { %p4740_p3 = por %p4739_p2, %p4738_p1 }
  0x26   :  { %p4741_p4 = pnand %p4740_p3, %p4734_p0 }
  0x81   :  { %v43_v29 = vpop.permute.xlu0 %42 }
  0x82   :  { %vm47_vm0 = vcmp.eq.s32.totalorder %v4885_v28, %v43_v29 }
  0x83   :  { %4275 = vmatprep.mubr.msk.f32.mxu0 %vm47_vm0, %v4758_v30 }
  0x85   :  { %v46_v31 = vpop.permute.xlu0 %45 }
  0x86   :  { %vm48_vm1 = vcmp.eq.s32.totalorder %v4885_v28, %v46_v31 }
  0x87   :  { %4276 = vmatmul.mubr.msk.f32.vlgmr.msra.gmra.mrb[0].mxu0 %vm48_vm1, %v4758_v30 }
  0x88   :  { %4323 = vmatprep.mubr.msk.f32.mxu0 %vm4760_vm3, %v4759_v51 }
 0x15a   :  { %v4277_v33 = vpop.f32.mrb[0].mxu0 }
 0x15b   :  { %v137_v35 = vpop.f32.mrb[1].mxu0  ;;  %v4897_v37 = vadd.f32 %v4277_v33, %v70_v34 }
 0x15c   :  { %v4895_v36 = vadd.f32 %v137_v35, %v69_v32 }
 0x15d   :  { %v155_v39 = vsel %vm151_vm2, %v4897_v37, 0.0 }
 0x15e   :  { %v152_v38 = vsel %vm151_vm2, %v4895_v36, 0.0 }
 0x15f   :  { %153 = vadd.xlane.f32.xlu1 %v152_v38 }
 0x163   :  { %156 = vadd.xlane.f32.xlu1 %v155_v39 }
 0x1ec   :  { %v154_v40 = vpop.xlane.xlu1 %153 }
 0x1ed   :  { %v159_v41 = vmul.f32 0.03125, %v154_v40 }
 0x1ef   :  { %v161_v42 = vsub.f32 %v4895_v36, %v159_v41 }
 0x1f0   :  { %v157_v43 = vpop.xlane.xlu1 %156 }
 0x1f1   :  { %v160_v44 = vmul.f32 0.03125, %v157_v43  ;;  %v163_v45 = vmul.f32 %v161_v42, %v161_v42 }
 0x1f3   :  { %v162_v46 = vsub.f32 %v4897_v37, %v160_v44  ;;  %v165_v47 = vsel %vm151_vm2, %v163_v45, 0.0 }
 0x1f4   :  { %166 = vadd.xlane.f32.xlu0 %v165_v47 }
 0x1f5   :  { %v164_v48 = vmul.f32 %v162_v46, %v162_v46 }
 0x1f7   :  { %v168_v49 = vsel %vm151_vm2, %v164_v48, 0.0 }
 0x1f8   :  { %169 = vadd.xlane.f32.xlu1 %v168_v49 }
 0x281   :  { %v167_v53 = vpop.xlane.xlu0 %166 }
 0x282   :  { %v171_v54 = vmul.f32 0.03125, %v167_v53 }
 0x284   :  { %v173_v55 = vadd.f32 1e-05, %v171_v54 }
 0x285   :  { %v170_v56 = vpop.xlane.xlu1 %169 }
 0x286   :  { %4633 = vrsqrt.f32 %v173_v55  ;;  %v172_v57 = vmul.f32 0.03125, %v170_v56 }
 0x288   :  { %v174_v58 = vadd.f32 1e-05, %v172_v57 }
 0x28a   :  { %4635 = vrsqrt.f32 %v174_v58 }
 0x290   :  { %v4634_v59 = vpop.eup %4633 }
 0x291   :  { %v177_v60 = vmul.f32 %v4634_v59, %v161_v42 }
 0x293   :  { %v183_v0 = vmul.f32 %v3985_v61, %v177_v60 }
 0x294   :  { %v4636_v62 = vpop.eup %4635 }
 0x295   :  { %v178_v63 = vmul.f32 %v4636_v62, %v162_v46  ;;  %v189_v3 = vadd.f32 %v3986_v1, %v183_v0 }
 0x297   :  { %v184_v2 = vmul.f32 %v3985_v61, %v178_v63 }
 0x299   :  { %v190_v4 = vadd.f32 %v3986_v1, %v184_v2 }
 0x29b   :  { %v191_v5 = vpack.c.bf16 %v190_v4, %v189_v3 }
 0x29d   :  { %4283 = vmatmul.mubr.msk.bf16.vlgmr.msra.gmra.mrb[0].mxu1 %vm151_vm2, %v191_v5 }
 0x29e   :  { %4288 = vmatprep.mubr.msk.f32.mxu1 %vm4760_vm3, %v4759_v51 }
 0x370   :  { %v250_v7 = vpop.f32.mrb[0].mxu1 }
 0x371   :  { %v4933_v8 = vadd.f32 %v3987_v6, %v250_v7  ;;  %v4284_v9 = vpop.f32.mrb[1].mxu1 }
 0x372   :  { %v253_v10 = vpop.f32.mrb[2].mxu1 }
 0x373   :  { %444 = vrot.lane.b32.xlu0 %v4933_v8, %s4761_s19  ;;  %262 = vrot.lane.b32.xlu1 %v4933_v8, %s4762_s20  ;;  %v4285_v11 = vpop.f32.mrb[3].mxu1  ;;  %v4939_v12 = vadd.f32 %v3987_v6, %v253_v10 }
 0x377   :  { %340 = vrot.lane.b32.xlu1 %v4939_v12, %s4762_s20 }
 0x3e5   :  { %v263_v13 = vpop.permute.xlu1 %262  ;;  %v445_v15 = vpop.permute.xlu0 %444 }
 0x3e6   :  { %4287 = vmatpush3.xpose.msk.msra.mxu1 %vm264_vm4, %v263_v13 }
 0x3e7   :  { %4291 = vmatprep.subr.mxu1 %v4759_v51 }
 0x3e9   :  { %4289 = vmatmul.mubr.msk.f32.vlgmr.msra.gmra.mrb[4].mxu1 %vm264_vm4, %v4933_v8  ;;  %v341_v14 = vpop.permute.xlu1 %340 }
 0x3ea   :  { %4292 = vmatpush3.xpose.msk.msra.mxu1 %vm264_vm4, %v341_v14  ;;  %4293 = vmatprep.mubr.msk.f32.mxu1 %vm4760_vm3, %v4759_v51 }
 0x3eb   :  { %4296 = vmatprep.subr.mxu1 %v4759_v51 }
 0x3ed   :  { %4294 = vmatmul.mubr.msk.f32.vlgmr.msra.gmra.mrb[6].mxu1 %vm264_vm4, %v4939_v12 }
 0x3ee   :  { %4297 = vmatpush3.msra.mxu1 %v445_v15  ;;  %4298 = vmatprep.mubr.msk.f32.mxu1 %vm4760_vm3, %v4759_v51 }
 0x3ef   :  { %4301 = vmatprep.subr.mxu1 %v4759_v51 }
 0x4bc   :  { %v335_v18 = vpop.f32.mrb[4].mxu1 }
 0x4bd   :  { %v416_v19 = vmul.f32 0.35355338, %v335_v18  ;;  %v4290_v20 = vpop.f32.mrb[5].mxu1 }
 0x4bf   :  { %v420_v21 = vsel %vm4958_vm5, %v416_v19, -1e+30 }
 0x4c0   :  { %v412_v22 = vpop.f32.mrb[6].mxu1  ;;  %v422_v23 = vsel %vm264_vm4, %v420_v21, -inf }
 0x4c1   :  { %v417_v24 = vmul.f32 0.35355338, %v412_v22  ;;  %423 = vmax.xlane.f32.xlu1 %v422_v23  ;;  %v4295_v25 = vpop.f32.mrb[7].mxu1 }
 0x4c3   :  { %v421_v26 = vsel %vm4958_vm5, %v417_v24, -1e+30 }
 0x4c4   :  { %v425_v27 = vsel %vm264_vm4, %v421_v26, -inf }
 0x4c5   :  { %426 = vmax.xlane.f32.xlu0 %v425_v27 }
 0x4d2   :  { %520 = vrot.lane.b32.xlu1 %v4939_v12, %s4761_s19 }
 0x4db   :  { %599 = vrot.lane.b32.xlu0 %v4933_v8, %s4763_s21 }
 0x54e   :  { %v424_v28 = vpop.xlane.xlu1 %423 }
 0x54f   :  { %v428_v29 = vsub.f32 %v420_v21, %v424_v28 }
 0x551   :  { %v430_v30 = vmul.f32 1.442695, %v428_v29 }
 0x552   :  { %v427_v33 = vpop.xlane.xlu0 %426  ;;  %v521_v44 = vpop.permute.xlu1 %520 }
 0x553   :  { %4637 = vpow2.f32 %v430_v30  ;;  %v429_v34 = vsub.f32 %v421_v26, %v427_v33  ;;  %v258_v26 = vld [vmem:[%s5538_s4 + $0x4] sm:$0xf]  ;;  %v257_v30 = vld [vmem:[%s5538_s4] sm:$0xf] }
 0x554   :  { %v937_v27 = vsel %vm935_vm6, %v258_v26, 0 }
 0x555   :  { %v432_v35 = vmul.f32 1.442695, %v429_v34  ;;  %v984_v34 = vsel %vm935_vm6, %v257_v30, 0 }
 0x556   :  { %v600_v40 = vpop.permute.xlu0 %599 }
 0x557   :  { %4639 = vpow2.f32 %v432_v35 }
 0x55d   :  { %v4638_v31 = vpop.eup %4637 }
 0x55e   :  { %v434_v32 = vsel %vm264_vm4, %v4638_v31, 0.0 }
 0x55f   :  { %435 = vadd.xlane.f32.xlu0 %v434_v32 }
 0x561   :  { %v4640_v38 = vpop.eup %4639 }
 0x562   :  { %v437_v39 = vsel %vm264_vm4, %v4640_v38, 0.0 }
 0x575   :  { %597 = vrot.lane.b32.xlu0 %v4933_v8, %s4764_s22 }
 0x594   :  { %438 = vadd.xlane.f32.xlu0 %v437_v39 }
 0x5aa   :  { %677 = vrot.lane.b32.xlu0 %v4939_v12, %s4763_s21 }
 0x5ae   :  { %675 = vrot.lane.b32.xlu0 %v4939_v12, %s4764_s22 }
 0x5ec   :  { %v436_v41 = vpop.xlane.xlu0 %435 }
 0x5ed   :  { %4641 = vrcp.f32 %v436_v41 }
 0x5f0   :  { %v598_v45 = vpop.permute.xlu0 %597 }
 0x5f7   :  { %v4642_v42 = vpop.eup %4641 }
 0x5f8   :  { %v442_v43 = vmul.f32 %v4642_v42, %v4638_v31 }
 0x5fa   :  { %4299 = vmatmul.mubr.msk.f32.vlgmr.msra.gmra.mrb[8].mxu1 %vm264_vm4, %v442_v43 }
 0x5fb   :  { %4302 = vmatpush3.msra.mxu1 %v521_v44  ;;  %4303 = vmatprep.mubr.msk.f32.mxu1 %vm4760_vm3, %v4759_v51 }
 0x5fc   :  { %4306 = vmatprep.subr.mxu1 %v4759_v51 }
 0x621   :  { %v439_v46 = vpop.xlane.xlu0 %438 }
 0x622   :  { %4643 = vrcp.f32 %v439_v46 }
 0x625   :  { %v678_v49 = vpop.permute.xlu0 %677 }
 0x629   :  { %v676_v50 = vpop.permute.xlu0 %675 }
 0x62c   :  { %v4644_v47 = vpop.eup %4643 }
 0x62d   :  { %v443_v48 = vmul.f32 %v4644_v47, %v4640_v38 }
 0x62f   :  { %4304 = vmatmul.mubr.msk.f32.vlgmr.msra.gmra.mrb[10].mxu1 %vm264_vm4, %v443_v48 }
 0x630   :  { %4307 = vmatpush3.xpose.msk.msra.mxu1 %vm264_vm4, %v600_v40  ;;  %4308 = vmatprep.mubr.msk.f32.mxu1 %vm4760_vm3, %v4759_v51 }
 0x631   :  { %4311 = vmatprep.subr.mxu1 %v4759_v51 }
 0x633   :  { %4309 = vmatmul.mubr.msk.f32.vlgmr.msra.gmra.mrb[12].mxu1 %vm264_vm4, %v598_v45 }
 0x634   :  { %4312 = vmatpush3.xpose.msk.msra.mxu1 %vm264_vm4, %v678_v49  ;;  %4313 = vmatprep.mubr.msk.f32.mxu1 %vm4760_vm3, %v4759_v51 }
 0x635   :  { %4316 = vmatprep.subr.mxu1 %v4759_v51 }
 0x637   :  { %4314 = vmatmul.mubr.msk.f32.vlgmr.msra.gmra.mrb[14].mxu1 %vm264_vm4, %v676_v50 }
 0x638   :  { %4318 = vmatprep.mubr.msk.f32.mxu1 %vm4760_vm3, %v4759_v51 }
 0x6cd   :  { %v4997_v52 = vpop.f32.mrb[8].mxu1 }
 0x6ce   :  { %v4300_v53 = vpop.f32.mrb[9].mxu1 }
 0x702   :  { %v4999_v54 = vpop.f32.mrb[10].mxu1 }
 0x703   :  { %v596_v55 = vpack.c.bf16 %v4999_v54, %v4997_v52  ;;  %v4305_v56 = vpop.f32.mrb[11].mxu1 }
 0x706   :  { %v671_v57 = vpop.f32.mrb[12].mxu1 }
 0x707   :  { %v753_v58 = vmul.f32 0.35355338, %v671_v57  ;;  %v4310_v59 = vpop.f32.mrb[13].mxu1 }
 0x709   :  { %v755_v60 = vsel %vm4958_vm5, %v753_v58, -1e+30 }
 0x70a   :  { %v749_v61 = vpop.f32.mrb[14].mxu1  ;;  %v757_v62 = vsel %vm264_vm4, %v755_v60, -inf }
 0x70b   :  { %v754_v63 = vmul.f32 0.35355338, %v749_v61  ;;  %758 = vmax.xlane.f32.xlu1 %v757_v62  ;;  %v4315_v0 = vpop.f32.mrb[15].mxu1 }
 0x70d   :  { %v756_v1 = vsel %vm4958_vm5, %v754_v63, -1e+30 }
 0x70e   :  { %v760_v2 = vsel %vm264_vm4, %v756_v1, -inf }
 0x70f   :  { %761 = vmax.xlane.f32.xlu0 %v760_v2 }
 0x798   :  { %v759_v3 = vpop.xlane.xlu1 %758 }
 0x799   :  { %v763_v4 = vsub.f32 %v755_v60, %v759_v3 }
 0x79b   :  { %v765_v5 = vmul.f32 1.442695, %v763_v4 }
 0x79c   :  { %v762_v6 = vpop.xlane.xlu0 %761 }
 0x79d   :  { %4645 = vpow2.f32 %v765_v5  ;;  %v764_v7 = vsub.f32 %v756_v1, %v762_v6 }
 0x79f   :  { %v767_v9 = vmul.f32 1.442695, %v764_v7 }
 0x7a1   :  { %4647 = vpow2.f32 %v767_v9 }
 0x7a7   :  { %v4646_v10 = vpop.eup %4645 }
 0x7a8   :  { %v769_v11 = vsel %vm264_vm4, %v4646_v10, 0.0 }
 0x7a9   :  { %770 = vadd.xlane.f32.xlu0 %v769_v11 }
 0x7ab   :  { %v4648_v13 = vpop.eup %4647 }
 0x7ac   :  { %v772_v14 = vsel %vm264_vm4, %v4648_v13, 0.0 }
 0x7ad   :  { %773 = vadd.xlane.f32.xlu1 %v772_v14 }
 0x7be   :  { %855 = vrot.lane.b32.xlu1 %v4939_v12, %s4765_s23 }
 0x7bf   :  { %779 = vrot.lane.b32.xlu0 %v4933_v8, %s4765_s23 }
 0x7c2   :  { %1107 = vrot.lane.b32.xlu1 %v4939_v12, %s4766_s24 }
 0x7c3   :  { %1105 = vrot.lane.b32.xlu0 %v4939_v12, %s4767_s25 }
 0x7c6   :  { %1029 = vrot.lane.b32.xlu1 %v4933_v8, %s4766_s24 }
 0x7c7   :  { %1027 = vrot.lane.b32.xlu0 %v4933_v8, %s4767_s25 }
 0x836   :  { %v771_v15 = vpop.xlane.xlu0 %770 }
 0x837   :  { %4649 = vrcp.f32 %v771_v15 }
 0x83a   :  { %v774_v16 = vpop.xlane.xlu1 %773  ;;  %v780_v18 = vpop.permute.xlu0 %779 }
 0x83b   :  { %4651 = vrcp.f32 %v774_v16  ;;  %4317 = vmatpush3.msra.mxu1 %v780_v18 }
 0x83c   :  { %4326 = vmatprep.subr.bf16.mxu1 %v4759_v51 }
 0x83e   :  { %v856_v19 = vpop.permute.xlu1 %855  ;;  %v1106_v25 = vpop.permute.xlu0 %1105 }
 0x83f   :  { %4322 = vmatpush3.msra.mxu0 %v856_v19 }
 0x840   :  { %4343 = vmatprep.subr.mxu0 %v4759_v51 }
 0x841   :  { %v4650_v20 = vpop.eup %4649 }
 0x842   :  { %v777_v21 = vmul.f32 %v4650_v20, %v4646_v10  ;;  %v1108_v24 = vpop.permute.xlu1 %1107  ;;  %v1028_v43 = vpop.permute.xlu0 %1027 }
 0x844   :  { %4319 = vmatmul.mubr.msk.f32.vlgmr.msra.gmra.mrb[16].mxu1 %vm264_vm4, %v777_v21 }
 0x845   :  { %v4652_v22 = vpop.eup %4651  ;;  %4328 = vmatprep.mubr.msk.bf16.mxu1 %vm4760_vm3, %v4759_v51  ;;  %4327 = vmatpush3.bf16.msra.mxu1 %v937_v27 }
 0x846   :  { %v778_v23 = vmul.f32 %v4652_v22, %v4648_v13  ;;  %4332 = vmatprep.subr.bf16.mxu1 %v4759_v51  ;;  %v1030_v42 = vpop.permute.xlu1 %1029 }
 0x848   :  { %4324 = vmatmul.mubr.msk.f32.vlgmr.msra.gmra.mrb[2].mxu0 %vm264_vm4, %v778_v23 }
 0x849   :  { %4344 = vmatpush3.xpose.msk.msra.mxu0 %vm264_vm4, %v1108_v24  ;;  %4345 = vmatprep.mubr.msk.f32.mxu0 %vm4760_vm3, %v4759_v51 }
 0x84a   :  { %4353 = vmatprep.subr.mxu0 %v4759_v51 }
 0x84c   :  { %4346 = vmatmul.mubr.msk.f32.vlgmr.msra.gmra.mrb[4].mxu0 %vm264_vm4, %v1106_v25 }
 0x84d   :  { %4355 = vmatprep.mubr.msk.f32.mxu0 %vm4760_vm3, %v4759_v51 }
 0x917   :  { %v851_v28 = vpop.f32.mrb[16].mxu1 }
 0x918   :  { %v4320_v29 = vpop.f32.mrb[17].mxu1 }
 0x91b   :  { %v927_v31 = vpop.f32.mrb[2].mxu0 }
 0x91c   :  { %v931_v32 = vpack.c.bf16 %v927_v31, %v851_v28  ;;  %v4325_v33 = vpop.f32.mrb[3].mxu0 }
 0x91e   :  { %4329 = vmatmul.mubr.msk.bf16.vlgmr.msra.gmra.mrb[20].mxu1 %vm264_vm4, %v931_v32  ;;  %v259_v32 = vld [vmem:[%s5538_s4 + $0x8] sm:$0xf] }
 0x91f   :  { %4333 = vmatpush3.bf16.msra.mxu1 %v984_v34  ;;  %v1179_v35 = vpop.f32.mrb[4].mxu0  ;;  %4334 = vmatprep.mubr.msk.bf16.mxu1 %vm4760_vm3, %v4759_v51  ;;  %v1366_v33 = vsel %vm935_vm6, %v259_v32, 0 }
 0x920   :  { %v1184_v38 = vmul.f32 0.35355338, %v1179_v35  ;;  %v4347_v39 = vpop.f32.mrb[5].mxu0  ;;  %4338 = vmatprep.subr.mxu1 %v4759_v51 }
 0x922   :  { %v1186_v40 = vsel %vm4958_vm5, %v1184_v38, -1e+30 }
 0x923   :  { %v1190_v41 = vsel %vm264_vm4, %v1186_v40, -inf }
 0x924   :  { %1191 = vmax.xlane.f32.xlu1 %v1190_v41 }
 0x926   :  { %4335 = vmatmul.mubr.msk.bf16.vlgmr.msra.gmra.mrb[24].mxu1 %vm264_vm4, %v596_v55 }
 0x927   :  { %4340 = vmatprep.mubr.msk.f32.mxu1 %vm4760_vm3, %v4759_v51 }
 0x928   :  { %4339 = vmatpush3.xpose.msk.msra.mxu1 %vm264_vm4, %v1030_v42 }
 0x929   :  { %4348 = vmatprep.subr.mxu1 %v4759_v51 }
 0x92e   :  { %4341 = vmatmul.mubr.msk.f32.vlgmr.msra.gmra.mrb[18].mxu1 %vm264_vm4, %v1028_v43 }
 0x92f   :  { %4350 = vmatprep.mubr.msk.f32.mxu1 %vm4760_vm3, %v4759_v51 }
 0x935   :  { %1413 = vrot.lane.b32.xlu1 %v4933_v8, %s4768_s29 }
 0x939   :  { %1411 = vrot.lane.b32.xlu1 %v4933_v8, %s4769_s30 }
 0x93d   :  { %1489 = vrot.lane.b32.xlu1 %v4939_v12, %s4769_s30 }
 0x9b1   :  { %v1192_v44 = vpop.xlane.xlu1 %1191 }
 0x9b2   :  { %v1194_v45 = vsub.f32 %v1186_v40, %v1192_v44 }
 0x9b4   :  { %v1197_v46 = vmul.f32 1.442695, %v1194_v45 }
 0x9b5   :  { %v1414_v3 = vpop.permute.xlu1 %1413 }
 0x9b6   :  { %4653 = vpow2.f32 %v1197_v46 }
 0x9b9   :  { %v1412_v6 = vpop.permute.xlu1 %1411 }
 0x9bd   :  { %v1490_v7 = vpop.permute.xlu1 %1489 }
 0x9c0   :  { %v4654_v47 = vpop.eup %4653 }
 0x9c1   :  { %v1202_v48 = vsel %vm264_vm4, %v4654_v47, 0.0 }
 0x9c2   :  { %1203 = vadd.xlane.f32.xlu0 %v1202_v48 }
 0x9d8   :  { %1285 = vrot.lane.b32.xlu0 %v4939_v12, %s4770_s2 }
 0x9dc   :  { %1491 = vrot.lane.b32.xlu0 %v4939_v12, %s4768_s29 }
 0x9f1   :  { %v973_v49 = vpop.f32.mrb[20].mxu1 }
 0x9f2   :  { %v4330_v50 = vpop.f32.mrb[21].mxu1 }
 0x9f3   :  { %v976_v52 = vpop.f32.mrb[22].mxu1 }
 0x9f4   :  { %v4331_v53 = vpop.f32.mrb[23].mxu1 }
 0x9f9   :  { %v1020_v54 = vpop.f32.mrb[24].mxu1 }
 0x9fa   :  { %v5074_v55 = vadd.f32 %v1020_v54, %v973_v49  ;;  %v4336_v56 = vpop.f32.mrb[25].mxu1 }
 0x9fb   :  { %v1023_v57 = vpop.f32.mrb[26].mxu1 }
 0x9fc   :  { %v5076_v58 = vadd.f32 %v1023_v57, %v976_v52  ;;  %v4337_v59 = vpop.f32.mrb[27].mxu1 }
 0x9fd   :  { %v260_v59 = vld [vmem:[%s5538_s4 + $0xc] sm:$0xf] }
 0xa01   :  { %v1101_v60 = vpop.f32.mrb[18].mxu1 }
 0xa02   :  { %v1183_v61 = vmul.f32 0.35355338, %v1101_v60  ;;  %v4342_v62 = vpop.f32.mrb[19].mxu1  ;;  %v1750_v60 = vsel %vm935_vm6, %v260_v59, 0  ;;  %v4620_v59 = vld [vmem:[%s5540_s6 + $0x38] sm:$0xff]  }
 0xa04   :  { %v1185_v63 = vsel %vm4958_vm5, %v1183_v61, -1e+30 }
 0xa05   :  { %v1187_v0 = vsel %vm264_vm4, %v1185_v63, -inf }
 0xa06   :  { %1188 = vmax.xlane.f32.xlu0 %v1187_v0 }
 0xa1c   :  { %1209 = vrot.lane.b32.xlu0 %v4933_v8, %s4770_s2 }
 0xa20   :  { %1593 = vrot.lane.b32.xlu0 %v4933_v8, %s4771_s11 }
 0xa4f   :  { %v1204_v1 = vpop.xlane.xlu0 %1203 }
 0xa50   :  { %4655 = vrcp.f32 %v1204_v1 }
 0xa53   :  { %v1286_v2 = vpop.permute.xlu0 %1285 }
 0xa54   :  { %4354 = vmatpush3.msra.mxu0 %v1286_v2 }
 0xa55   :  { %4364 = vmatprep.subr.mxu0 %v4759_v51 }
 0xa57   :  { %v1492_v8 = vpop.permute.xlu0 %1491 }
 0xa5a   :  { %v4656_v4 = vpop.eup %4655 }
 0xa5b   :  { %v1208_v5 = vmul.f32 %v4656_v4, %v4654_v47 }
 0xa5d   :  { %4356 = vmatmul.mubr.msk.f32.vlgmr.msra.gmra.mrb[6].mxu0 %vm264_vm4, %v1208_v5 }
 0xa5e   :  { %4365 = vmatpush3.xpose.msk.msra.mxu0 %vm264_vm4, %v1414_v3  ;;  %4366 = vmatprep.mubr.msk.f32.mxu0 %vm4760_vm3, %v4759_v51 }
 0xa5f   :  { %4369 = vmatprep.subr.mxu0 %v4759_v51 }
 0xa61   :  { %4367 = vmatmul.mubr.msk.f32.vlgmr.msra.gmra.mrb[8].mxu0 %vm264_vm4, %v1412_v6 }
 0xa62   :  { %4370 = vmatpush3.xpose.msk.msra.mxu0 %vm264_vm4, %v1492_v8  ;;  %4371 = vmatprep.mubr.msk.f32.mxu0 %vm4760_vm3, %v4759_v51 }
 0xa63   :  { %4379 = vmatprep.subr.mxu0 %v4759_v51 }
 0xa65   :  { %4372 = vmatmul.mubr.msk.f32.vlgmr.msra.gmra.mrb[10].mxu0 %vm264_vm4, %v1490_v7 }
 0xa66   :  { %4381 = vmatprep.mubr.msk.f32.mxu0 %vm4760_vm3, %v4759_v51 }
 0xa93   :  { %v1189_v9 = vpop.xlane.xlu0 %1188 }
 0xa94   :  { %v1193_v10 = vsub.f32 %v1185_v63, %v1189_v9 }
 0xa96   :  { %v1195_v11 = vmul.f32 1.442695, %v1193_v10 }
 0xa97   :  { %v1210_v13 = vpop.permute.xlu0 %1209 }
 0xa98   :  { %4657 = vpow2.f32 %v1195_v11  ;;  %4349 = vmatpush3.msra.mxu1 %v1210_v13 }
 0xa99   :  { %4358 = vmatprep.subr.bf16.mxu1 %v4759_v51 }
 0xa9b   :  { %v1594_v49 = vpop.permute.xlu0 %1593 }
 0xaa2   :  { %v4658_v14 = vpop.eup %4657 }
 0xaa3   :  { %v1199_v15 = vsel %vm264_vm4, %v4658_v14, 0.0 }
 0xaa4   :  { %1200 = vadd.xlane.f32.xlu1 %v1199_v15 }
 0xb30   :  { %v1357_v16 = vpop.f32.mrb[6].mxu0 }
 0xb31   :  { %v4357_v18 = vpop.f32.mrb[7].mxu0  ;;  %v1201_v19 = vpop.xlane.xlu1 %1200 }
 0xb32   :  { %4659 = vrcp.f32 %v1201_v19 }
 0xb34   :  { %v1485_v20 = vpop.f32.mrb[8].mxu0 }
 0xb35   :  { %v1567_v21 = vmul.f32 0.35355338, %v1485_v20  ;;  %v4368_v22 = vpop.f32.mrb[9].mxu0 }
 0xb37   :  { %v1569_v23 = vsel %vm4958_vm5, %v1567_v21, -1e+30 }
 0xb38   :  { %v1563_v24 = vpop.f32.mrb[10].mxu0  ;;  %v1571_v25 = vsel %vm264_vm4, %v1569_v23, -inf }
 0xb39   :  { %v1568_v26 = vmul.f32 0.35355338, %v1563_v24  ;;  %v4373_v27 = vpop.f32.mrb[11].mxu0  ;;  %1572 = vmax.xlane.f32.xlu1 %v1571_v25 }
 0xb3b   :  { %v1570_v28 = vsel %vm4958_vm5, %v1568_v26, -1e+30 }
 0xb3c   :  { %v4660_v29 = vpop.eup %4659  ;;  %v1574_v30 = vsel %vm264_vm4, %v1570_v28, -inf }
 0xb3d   :  { %v1207_v31 = vmul.f32 %v4660_v29, %v4658_v14  ;;  %1575 = vmax.xlane.f32.xlu1 %v1574_v30  ;;  %v4611_v29 = vld [vmem:[%s5539_s5] sm:$0xff]   ;;  %v4612_v30 = vld [vmem:[%s5539_s5 + $0x8] sm:$0xff]  }
 0xb3f   :  { %4351 = vmatmul.mubr.msk.f32.vlgmr.msra.gmra.mrb[28].mxu1 %vm264_vm4, %v1207_v31 }
 0xb40   :  { %4360 = vmatprep.mubr.msk.bf16.mxu1 %vm4760_vm3, %v4759_v51  ;;  %4359 = vmatpush3.bf16.msra.mxu1 %v1366_v33 }
 0xb41   :  { %4374 = vmatprep.subr.mxu1 %v4759_v51 }
 0xbc6   :  { %v1573_v34 = vpop.xlane.xlu1 %1572 }
 0xbc7   :  { %v1577_v35 = vsub.f32 %v1569_v23, %v1573_v34 }
 0xbc9   :  { %v1579_v38 = vmul.f32 1.442695, %v1577_v35 }
 0xbca   :  { %v1576_v39 = vpop.xlane.xlu1 %1575 }
 0xbcb   :  { %4661 = vpow2.f32 %v1579_v38  ;;  %v1578_v40 = vsub.f32 %v1570_v28, %v1576_v39 }
 0xbcd   :  { %v1581_v41 = vmul.f32 1.442695, %v1578_v40 }
 0xbcf   :  { %4663 = vpow2.f32 %v1581_v41  ;;  %v4020_v41 = vld [vmem:[%s5541_s7 + $0x2] ss:$0 sm:$0xff] }
 0xbd5   :  { %v4662_v42 = vpop.eup %4661 }
 0xbd6   :  { %v1583_v43 = vsel %vm264_vm4, %v4662_v42, 0.0 }
 0xbd7   :  { %1584 = vadd.xlane.f32.xlu1 %v1583_v43 }
 0xbd9   :  { %v4664_v44 = vpop.eup %4663 }
 0xbda   :  { %v1586_v45 = vsel %vm264_vm4, %v4664_v44, 0.0 }
 0xbdb   :  { %1587 = vadd.xlane.f32.xlu1 %v1586_v45  ;;  %v4021_v45 = vld [vmem:[%s5541_s7 + $0x3] ss:$0 sm:$0xff] }
 0xbec   :  { %1669 = vrot.lane.b32.xlu1 %v4939_v12, %s4771_s11 }
 0xc12   :  { %v1281_v46 = vpop.f32.mrb[28].mxu1 }
 0xc13   :  { %v1361_v47 = vpack.c.bf16 %v1357_v16, %v1281_v46  ;;  %v4352_v48 = vpop.f32.mrb[29].mxu1 }
 0xc15   :  { %4361 = vmatmul.mubr.msk.bf16.vlgmr.msra.gmra.mrb[32].mxu1 %vm264_vm4, %v1361_v47 }
 0xc16   :  { %4375 = vmatpush3.msra.mxu1 %v1594_v49  ;;  %4376 = vmatprep.mubr.msk.f32.mxu1 %vm4760_vm3, %v4759_v51 }
 0xc17   :  { %4384 = vmatprep.subr.bf16.mxu1 %v4759_v51 }
 0xc64   :  { %v1585_v50 = vpop.xlane.xlu1 %1584 }
 0xc65   :  { %4665 = vrcp.f32 %v1585_v50  ;;  %v4613_v50 = vld [vmem:[%s5540_s6] sm:$0xff]  }
 0xc68   :  { %v1588_v52 = vpop.xlane.xlu1 %1587 }
 0xc69   :  { %4667 = vrcp.f32 %v1588_v52  ;;  %v4614_v52 = vld [vmem:[%s5540_s6 + $0x8] sm:$0xff]  }
 0xc6c   :  { %v1670_v53 = vpop.permute.xlu1 %1669 }
 0xc6d   :  { %4380 = vmatpush3.msra.mxu0 %v1670_v53  ;;  %v4615_v53 = vld [vmem:[%s5540_s6 + $0x10] sm:$0xff]  }
 0xc6e   :  { %4390 = vmatprep.subr.bf16.mxu0 %v4759_v51 }
 0xc6f   :  { %v4666_v12 = vpop.eup %4665 }
 0xc70   :  { %v1591_v54 = vmul.f32 %v4666_v12, %v4662_v42  ;;  %v4616_v12 = vld [vmem:[%s5540_s6 + $0x18] sm:$0xff]  }
 0xc72   :  { %4377 = vmatmul.mubr.msk.f32.vlgmr.msra.gmra.mrb[30].mxu1 %vm264_vm4, %v1591_v54  ;;  %v4617_v54 = vld [vmem:[%s5540_s6 + $0x20] sm:$0xff]  }
 0xc73   :  { %v4668_v56 = vpop.eup %4667  ;;  %4386 = vmatprep.mubr.msk.bf16.mxu1 %vm4760_vm3, %v4759_v51  ;;  %4385 = vmatpush3.bf16.msra.mxu1 %v1750_v60  ;;  %v4022_v60 = vld [vmem:[%s5543_s9] ss:$0 sm:$0xff] }
 0xc74   :  { %v1592_v57 = vmul.f32 %v4668_v56, %v4664_v44  ;;  %4398 = vmatprep.subr.bf16.mxu1 %v4759_v51  ;;  %v4618_v56 = vld [vmem:[%s5540_s6 + $0x28] sm:$0xff]  }
 0xc76   :  { %4382 = vmatmul.mubr.msk.f32.vlgmr.msra.gmra.mrb[12].mxu0 %vm264_vm4, %v1592_v57  ;;  %v4619_v57 = vld [vmem:[%s5540_s6 + $0x30] sm:$0xff]  }
 0xc77   :  { %4394 = vmatprep.mubr.msk.bf16.mxu0 %vm4760_vm3, %v4759_v51  ;;  %4391 = vmatpush3.bf16.msra.mxu0 %v4611_v29 }
 0xc78   :  { %4392 = vmatprep.subr.bf16.mxu0 %v4759_v51 }
 0xc7b   :  { %4393 = vmatpush3.bf16.msra.mxu0 %v4612_v30 }
 0xc7c   :  { %4418 = vmatprep.subr.bf16.mxu0 %v4759_v51 }
 0xce8   :  { %v1402_v61 = vpop.f32.mrb[32].mxu1 }
 0xce9   :  { %v1409_v62 = vadd.f32 %v1402_v61, %v5074_v55  ;;  %v4362_v63 = vpop.f32.mrb[33].mxu1  ;;  %v4019_v55 = vld [vmem:[%s5541_s7 + $0x4] ss:$0 sm:$0xff] }
 0xcea   :  { %v1405_v0 = vpop.f32.mrb[34].mxu1 }
 0xceb   :  { %v1410_v1 = vadd.f32 %v1405_v0, %v5076_v58  ;;  %v4363_v2 = vpop.f32.mrb[35].mxu1 }
 0xd45   :  { %v1665_v3 = vpop.f32.mrb[30].mxu1 }
 0xd46   :  { %v4378_v4 = vpop.f32.mrb[31].mxu1 }
 0xd49   :  { %v1741_v5 = vpop.f32.mrb[12].mxu0 }
 0xd4a   :  { %v1745_v6 = vpack.c.bf16 %v1741_v5, %v1665_v3  ;;  %v4383_v8 = vpop.f32.mrb[13].mxu0 }
 0xd4c   :  { %4387 = vmatmul.mubr.msk.bf16.vlgmr.msra.gmra.mrb[36].mxu1 %vm264_vm4, %v1745_v6 }
 0xd4d   :  { %4414 = vmatprep.mubr.msk.bf16.mxu1 %vm4760_vm3, %v4759_v51  ;;  %4399 = vmatpush3.bf16.msra.mxu1 %v4613_v50 }
 0xd4e   :  { %4400 = vmatprep.subr.bf16.mxu1 %v4759_v51 }
 0xd51   :  { %4401 = vmatpush3.bf16.msra.mxu1 %v4614_v52  ;;  %v4036_v52 = vld [vmem:[%s5541_s7 + $0x7] ss:$0 sm:$0xff] }
 0xd52   :  { %4402 = vmatprep.subr.bf16.mxu1 %v4759_v51 }
 0xd55   :  { %4403 = vmatpush3.bf16.msra.mxu1 %v4615_v53 }
 0xd56   :  { %4404 = vmatprep.subr.bf16.mxu1 %v4759_v51 }
 0xd59   :  { %4405 = vmatpush3.bf16.msra.mxu1 %v4616_v12 }
 0xd5a   :  { %4406 = vmatprep.subr.bf16.mxu1 %v4759_v51 }
 0xd5d   :  { %4407 = vmatpush3.bf16.msra.mxu1 %v4617_v54 }
 0xd5e   :  { %4408 = vmatprep.subr.bf16.mxu1 %v4759_v51 }
 0xd61   :  { %4409 = vmatpush3.bf16.msra.mxu1 %v4618_v56 }
 0xd62   :  { %4410 = vmatprep.subr.bf16.mxu1 %v4759_v51 }
 0xd65   :  { %4411 = vmatpush3.bf16.msra.mxu1 %v4619_v57  ;;  %v4041_v57 = vld [vmem:[%s5542_s8 + $0x1] ss:$0 sm:$0xff] }
 0xd66   :  { %4412 = vmatprep.subr.bf16.mxu1 %v4759_v51 }
 0xd69   :  { %4413 = vmatpush3.bf16.msra.mxu1 %v4620_v59 }
 0xd6a   :  { %4451 = vmatprep.subr.mxu1 %v4759_v51 }
 0xe1f   :  { %v1786_v7 = vpop.f32.mrb[36].mxu1 }
 0xe20   :  { %v1793_v9 = vadd.f32 %v1786_v7, %v1409_v62  ;;  %v4388_v10 = vpop.f32.mrb[37].mxu1 }
 0xe21   :  { %v1789_v11 = vpop.f32.mrb[38].mxu1 }
 0xe22   :  { %v1795_v58 = vadd.f32 %v1793_v9, %v4895_v36  ;;  %v1794_v13 = vadd.f32 %v1789_v11, %v1410_v1  ;;  %v4389_v14 = vpop.f32.mrb[39].mxu1 }
 0xe24   :  { %v5144_v15 = vadd.f32 %v4019_v55, %v1795_v58  ;;  %v1796_v16 = vadd.f32 %v1794_v13, %v4897_v37 }
 0xe26   :  { %v5147_v18 = vadd.f32 %v4019_v55, %v1796_v16  ;;  %v1806_v19 = vsel %vm151_vm2, %v5144_v15, 0.0 }
 0xe27   :  { %1807 = vadd.xlane.f32.xlu0 %v1806_v19  ;;  %v4034_v19 = vld [vmem:[%s5541_s7 + $0x5] ss:$0 sm:$0xff] }
 0xe28   :  { %v1809_v20 = vsel %vm151_vm2, %v5147_v18, 0.0 }
 0xe29   :  { %1810 = vadd.xlane.f32.xlu1 %v1809_v20 }
 0xeb4   :  { %v1808_v21 = vpop.xlane.xlu0 %1807 }
 0xeb5   :  { %v1812_v22 = vmul.f32 0.03125, %v1808_v21 }
 0xeb6   :  { %v1811_v23 = vpop.xlane.xlu1 %1810 }
 0xeb7   :  { %v1814_v36 = vsub.f32 %v5144_v15, %v1812_v22  ;;  %v1813_v24 = vmul.f32 0.03125, %v1811_v23 }
 0xeb9   :  { %v1815_v25 = vsub.f32 %v5147_v18, %v1813_v24  ;;  %v1816_v26 = vmul.f32 %v1814_v36, %v1814_v36 }
 0xebb   :  { %v1818_v37 = vsel %vm151_vm2, %v1816_v26, 0.0  ;;  %v1817_v27 = vmul.f32 %v1815_v25, %v1815_v25 }
 0xebc   :  { %1819 = vadd.xlane.f32.xlu0 %v1818_v37 }
 0xebd   :  { %v1821_v28 = vsel %vm151_vm2, %v1817_v27, 0.0 }
 0xec0   :  { %1822 = vadd.xlane.f32.xlu0 %v1821_v28 }
 0xf49   :  { %v1820_v31 = vpop.xlane.xlu0 %1819 }
 0xf4a   :  { %v1824_v32 = vmul.f32 0.03125, %v1820_v31 }
 0xf4c   :  { %v1826_v33 = vadd.f32 1e-05, %v1824_v32 }
 0xf4d   :  { %v1823_v34 = vpop.xlane.xlu0 %1822 }
 0xf4e   :  { %4669 = vrsqrt.f32 %v1826_v33  ;;  %v1825_v35 = vmul.f32 0.03125, %v1823_v34 }
 0xf50   :  { %v1827_v38 = vadd.f32 1e-05, %v1825_v35  ;;  %v4621_v35 = vld [vmem:[%s5537_s3 + $0x10] sm:$0xff]  }
 0xf52   :  { %4671 = vrsqrt.f32 %v1827_v38  ;;  %v4622_v38 = vld [vmem:[%s5537_s3 + $0x18] sm:$0xff]  }
 0xf58   :  { %v4670_v39 = vpop.eup %4669 }
 0xf59   :  { %v1830_v40 = vmul.f32 %v4670_v39, %v1814_v36 }
 0xf5b   :  { %v1836_v43 = vmul.f32 %v4020_v41, %v1830_v40 }
 0xf5c   :  { %v4672_v42 = vpop.eup %4671 }
 0xf5d   :  { %v1831_v44 = vmul.f32 %v4672_v42, %v1815_v25  ;;  %v1842_v47 = vadd.f32 %v4021_v45, %v1836_v43 }
 0xf5f   :  { %v1837_v46 = vmul.f32 %v4020_v41, %v1831_v44 }
 0xf61   :  { %v1843_v48 = vadd.f32 %v4021_v45, %v1837_v46 }
 0xf63   :  { %v1844_v49 = vpack.c.bf16 %v1843_v48, %v1842_v47  ;;  %v4035_v47 = vld [vmem:[%s5541_s7 + $0x6] ss:$0 sm:$0xff] }
 0xf65   :  { %4395 = vmatmul.mubr.msk.bf16.vlgmr.msra.gmra.mrb[16].mxu0 %vm151_vm2, %v1844_v49 }
 0xf66   :  { %4422 = vmatprep.mubr.msk.bf16.mxu0 %vm4760_vm3, %v4759_v51  ;;  %4419 = vmatpush3.bf16.msra.mxu0 %v4621_v35 }
 0xf67   :  { %4420 = vmatprep.subr.bf16.mxu0 %v4759_v51 }
 0xf6a   :  { %4421 = vmatpush3.bf16.msra.mxu0 %v4622_v38 }
 0xf6b   :  { %4426 = vmatprep.subr.mxu0 %v4759_v51 }
0x1038   :  { %v1903_v61 = vpop.f32.mrb[16].mxu0 }
0x1039   :  { %v1904_v62 = vadd.f32 %v4022_v60, %v1903_v61  ;;  %v4396_v63 = vpop.f32.mrb[17].mxu0 }
0x103a   :  { %v1906_v0 = vpop.f32.mrb[18].mxu0 }
0x103b   :  { %v1910_v1 = vmul.f32 -1.702, %v1904_v62  ;;  %v1907_v2 = vadd.f32 %v4022_v60, %v1906_v0  ;;  %v4397_v3 = vpop.f32.mrb[19].mxu0 }
0x103d   :  { %v1912_v4 = vmul.f32 1.442695, %v1910_v1  ;;  %v1911_v5 = vmul.f32 -1.702, %v1907_v2 }
0x103f   :  { %4673 = vpow2.f32 %v1912_v4  ;;  %v1914_v6 = vmul.f32 1.442695, %v1911_v5 }
0x1041   :  { %4675 = vpow2.f32 %v1914_v6 }
0x1049   :  { %v4674_v8 = vpop.eup %4673 }
0x104a   :  { %v1916_v7 = vadd.f32 1.0, %v4674_v8 }
0x104b   :  { %v4676_v9 = vpop.eup %4675 }
0x104c   :  { %4677 = vrcp.f32 %v1916_v7  ;;  %v1917_v10 = vadd.f32 1.0, %v4676_v9 }
0x104e   :  { %4679 = vrcp.f32 %v1917_v10 }
0x1056   :  { %v4678_v55 = vpop.eup %4677 }
0x1057   :  { %v1920_v58 = vmul.f32 %v4678_v55, %v1904_v62 }
0x1058   :  { %v4680_v11 = vpop.eup %4679 }
0x1059   :  { %v1921_v13 = vmul.f32 %v4680_v11, %v1907_v2 }
0x105b   :  { %v1922_v14 = vpack.c.bf16 %v1921_v13, %v1920_v58 }
0x105d   :  { %4415 = vmatmul.mubr.bf16.vlgmr.msra.gmra.mrb[40].mxu1 %v1922_v14 }
0x105e   :  { %4453 = vmatprep.mubr.msk.f32.mxu1 %vm4760_vm3, %v4759_v51 }
0x1130   :  { %v2021_v16 = vpop.f32.mrb[40].mxu1 }
0x1131   :  { %v2028_v20 = vadd.f32 %v2021_v16, %v5144_v15  ;;  %v4416_v21 = vpop.f32.mrb[41].mxu1 }
0x1132   :  { %v2024_v22 = vpop.f32.mrb[42].mxu1 }
0x1133   :  { %v5215_v23 = vadd.f32 %v4034_v19, %v2028_v20  ;;  %v2029_v36 = vadd.f32 %v2024_v22, %v5147_v18  ;;  %v4417_v24 = vpop.f32.mrb[43].mxu1 }
0x1135   :  { %v5218_v25 = vadd.f32 %v4034_v19, %v2029_v36  ;;  %v2039_v26 = vsel %vm151_vm2, %v5215_v23, 0.0 }
0x1136   :  { %2040 = vadd.xlane.f32.xlu0 %v2039_v26 }
0x1137   :  { %v2042_v37 = vsel %vm151_vm2, %v5218_v25, 0.0 }
0x113a   :  { %2043 = vadd.xlane.f32.xlu0 %v2042_v37 }
0x11c3   :  { %v2041_v27 = vpop.xlane.xlu0 %2040 }
0x11c4   :  { %v2045_v28 = vmul.f32 0.03125, %v2041_v27 }
0x11c6   :  { %v2047_v15 = vsub.f32 %v5215_v23, %v2045_v28 }
0x11c7   :  { %v2044_v29 = vpop.xlane.xlu0 %2043 }
0x11c8   :  { %v2046_v30 = vmul.f32 0.03125, %v2044_v29  ;;  %v2049_v31 = vmul.f32 %v2047_v15, %v2047_v15 }
0x11ca   :  { %v2048_v18 = vsub.f32 %v5218_v25, %v2046_v30  ;;  %v2051_v32 = vsel %vm151_vm2, %v2049_v31, 0.0 }
0x11cb   :  { %2052 = vadd.xlane.f32.xlu0 %v2051_v32 }
0x11cc   :  { %v2050_v33 = vmul.f32 %v2048_v18, %v2048_v18 }
0x11ce   :  { %v2054_v34 = vsel %vm151_vm2, %v2050_v33, 0.0 }
0x11cf   :  { %2055 = vadd.xlane.f32.xlu1 %v2054_v34 }
0x1258   :  { %v2053_v39 = vpop.xlane.xlu0 %2052 }
0x1259   :  { %v2057_v40 = vmul.f32 0.03125, %v2053_v39 }
0x125b   :  { %v2059_v41 = vadd.f32 1e-05, %v2057_v40 }
0x125c   :  { %v2056_v42 = vpop.xlane.xlu1 %2055 }
0x125d   :  { %4681 = vrsqrt.f32 %v2059_v41  ;;  %v2058_v43 = vmul.f32 0.03125, %v2056_v42 }
0x125f   :  { %v2060_v44 = vadd.f32 1e-05, %v2058_v43 }
0x1261   :  { %4683 = vrsqrt.f32 %v2060_v44 }
0x1267   :  { %v4682_v45 = vpop.eup %4681 }
0x1268   :  { %v2063_v46 = vmul.f32 %v4682_v45, %v2047_v15 }
0x126a   :  { %v2069_v49 = vmul.f32 %v4035_v47, %v2063_v46 }
0x126b   :  { %v4684_v48 = vpop.eup %4683 }
0x126c   :  { %v2064_v50 = vmul.f32 %v4684_v48, %v2048_v18  ;;  %v2075_v12 = vadd.f32 %v4036_v52, %v2069_v49 }
0x126e   :  { %v2070_v53 = vmul.f32 %v4035_v47, %v2064_v50 }
0x1270   :  { %v2076_v54 = vadd.f32 %v4036_v52, %v2070_v53 }
0x1272   :  { %v2077_v56 = vpack.c.bf16 %v2076_v54, %v2075_v12 }
0x1274   :  { %4423 = vmatmul.mubr.msk.bf16.vlgmr.msra.gmra.mrb[20].mxu0 %vm151_vm2, %v2077_v56 }
0x1275   :  { %4428 = vmatprep.mubr.msk.f32.mxu0 %vm4760_vm3, %v4759_v51 }
0x1347   :  { %v2137_v59 = vpop.f32.mrb[20].mxu0 }
0x1348   :  { %v5248_v60 = vadd.f32 %v4041_v57, %v2137_v59  ;;  %v4424_v61 = vpop.f32.mrb[21].mxu0 }
0x1349   :  { %v2140_v62 = vpop.f32.mrb[22].mxu0 }
0x134a   :  { %v5250_v63 = vadd.f32 %v4041_v57, %v2140_v62  ;;  %2150 = vrot.lane.b32.xlu0 %v5248_v60, %s4762_s20  ;;  %v4425_v0 = vpop.f32.mrb[23].mxu0 }
0x134c   :  { %2227 = vrot.lane.b32.xlu1 %v5250_v63, %s4762_s20 }
0x13bc   :  { %v2151_v1 = vpop.permute.xlu0 %2150 }
0x13bd   :  { %4427 = vmatpush3.xpose.msk.msra.mxu0 %vm264_vm4, %v2151_v1 }
0x13be   :  { %4431 = vmatprep.subr.mxu0 %v4759_v51  ;;  %v2228_v2 = vpop.permute.xlu1 %2227 }
0x13c0   :  { %4429 = vmatmul.mubr.msk.f32.vlgmr.msra.gmra.mrb[14].mxu0 %vm264_vm4, %v5248_v60 }
0x13c1   :  { %4432 = vmatpush3.xpose.msk.msra.mxu0 %vm264_vm4, %v2228_v2  ;;  %4433 = vmatprep.mubr.msk.f32.mxu0 %vm4760_vm3, %v4759_v51 }
0x13c2   :  { %4436 = vmatprep.subr.mxu0 %v4759_v51 }
0x13c4   :  { %4434 = vmatmul.mubr.msk.f32.vlgmr.msra.gmra.mrb[24].mxu0 %vm264_vm4, %v5250_v63 }
0x13c5   :  { %4438 = vmatprep.mubr.msk.f32.mxu0 %vm4760_vm3, %v4759_v51 }
0x1493   :  { %v2222_v3 = vpop.f32.mrb[14].mxu0 }
0x1494   :  { %v2303_v4 = vmul.f32 0.35355338, %v2222_v3  ;;  %v4430_v5 = vpop.f32.mrb[15].mxu0 }
0x1496   :  { %v2305_v6 = vsel %vm4958_vm5, %v2303_v4, -1e+30  ;;  %v4045_v4 = vld [vmem:[%s5538_s4 + $0x10] sm:$0xf] }
0x1497   :  { %v2299_v8 = vpop.f32.mrb[24].mxu0  ;;  %v2307_v7 = vsel %vm264_vm4, %v2305_v6, -inf }
0x1498   :  { %v2304_v9 = vmul.f32 0.35355338, %v2299_v8  ;;  %2308 = vmax.xlane.f32.xlu1 %v2307_v7  ;;  %v4435_v10 = vpop.f32.mrb[25].mxu0  ;;  %v2868_v7 = vsel %vm935_vm6, %v4045_v4, 0 }
0x149a   :  { %v2306_v55 = vsel %vm4958_vm5, %v2304_v9, -1e+30 }
0x149b   :  { %v2310_v11 = vsel %vm264_vm4, %v2306_v55, -inf }
0x149c   :  { %2311 = vmax.xlane.f32.xlu0 %v2310_v11 }
0x14a9   :  { %2405 = vrot.lane.b32.xlu1 %v5250_v63, %s4761_s19 }
0x14ad   :  { %2484 = vrot.lane.b32.xlu1 %v5248_v60, %s4763_s21 }
0x1525   :  { %v2309_v58 = vpop.xlane.xlu1 %2308 }
0x1526   :  { %v2313_v13 = vsub.f32 %v2305_v6, %v2309_v58 }
0x1528   :  { %v2315_v14 = vmul.f32 1.442695, %v2313_v13  ;;  %v4046_v13 = vld [vmem:[%s5538_s4 + $0x14] sm:$0xf] }
0x1529   :  { %v2312_v16 = vpop.xlane.xlu0 %2311  ;;  %v2406_v26 = vpop.permute.xlu1 %2405 }
0x152a   :  { %4685 = vpow2.f32 %v2315_v14  ;;  %v2314_v19 = vsub.f32 %v2306_v55, %v2312_v16  ;;  %v2821_v14 = vsel %vm935_vm6, %v4046_v13, 0 }
0x152c   :  { %v2317_v20 = vmul.f32 1.442695, %v2314_v19 }
0x152d   :  { %v2485_v37 = vpop.permute.xlu1 %2484 }
0x152e   :  { %4687 = vpow2.f32 %v2317_v20 }
0x1534   :  { %v4686_v21 = vpop.eup %4685 }
0x1535   :  { %v2319_v22 = vsel %vm264_vm4, %v4686_v21, 0.0 }
0x1536   :  { %2320 = vadd.xlane.f32.xlu0 %v2319_v22 }
0x1538   :  { %v4688_v36 = vpop.eup %4687 }
0x1539   :  { %v2322_v24 = vsel %vm264_vm4, %v4688_v36, 0.0 }
0x153a   :  { %2323 = vadd.xlane.f32.xlu1 %v2322_v24 }
0x154b   :  { %2482 = vrot.lane.b32.xlu1 %v5248_v60, %s4764_s22 }
0x154c   :  { %2329 = vrot.lane.b32.xlu0 %v5248_v60, %s4761_s19 }
0x1550   :  { %2562 = vrot.lane.b32.xlu0 %v5250_v63, %s4763_s21 }
0x1554   :  { %2560 = vrot.lane.b32.xlu0 %v5250_v63, %s4764_s22 }
0x15c3   :  { %v2321_v27 = vpop.xlane.xlu0 %2320 }
0x15c4   :  { %4689 = vrcp.f32 %v2321_v27 }
0x15c7   :  { %v2324_v28 = vpop.xlane.xlu1 %2323  ;;  %v2330_v15 = vpop.permute.xlu0 %2329 }
0x15c8   :  { %4691 = vrcp.f32 %v2324_v28  ;;  %4437 = vmatpush3.msra.mxu0 %v2330_v15 }
0x15c9   :  { %4441 = vmatprep.subr.mxu0 %v4759_v51 }
0x15cb   :  { %v2563_v29 = vpop.permute.xlu0 %2562  ;;  %v2483_v34 = vpop.permute.xlu1 %2482 }
0x15cc   :  { %4452 = vmatpush3.xpose.msk.msra.mxu1 %vm264_vm4, %v2563_v29 }
0x15cd   :  { %4461 = vmatprep.subr.mxu1 %v4759_v51 }
0x15ce   :  { %v4690_v30 = vpop.eup %4689 }
0x15cf   :  { %v2327_v31 = vmul.f32 %v4690_v30, %v4686_v21  ;;  %v2561_v18 = vpop.permute.xlu0 %2560 }
0x15d0   :  { %4454 = vmatmul.mubr.msk.f32.vlgmr.msra.gmra.mrb[44].mxu1 %vm264_vm4, %v2561_v18 }
0x15d1   :  { %4439 = vmatmul.mubr.msk.f32.vlgmr.msra.gmra.mrb[26].mxu0 %vm264_vm4, %v2327_v31  ;;  %4463 = vmatprep.mubr.msk.f32.mxu1 %vm4760_vm3, %v4759_v51 }
0x15d2   :  { %v4692_v32 = vpop.eup %4691  ;;  %4442 = vmatpush3.msra.mxu0 %v2406_v26  ;;  %4443 = vmatprep.mubr.msk.f32.mxu0 %vm4760_vm3, %v4759_v51 }
0x15d3   :  { %v2328_v33 = vmul.f32 %v4692_v32, %v4688_v36  ;;  %4446 = vmatprep.subr.mxu0 %v4759_v51 }
0x15d5   :  { %4444 = vmatmul.mubr.msk.f32.vlgmr.msra.gmra.mrb[28].mxu0 %vm264_vm4, %v2328_v33 }
0x15d6   :  { %4448 = vmatprep.mubr.msk.f32.mxu0 %vm4760_vm3, %v4759_v51 }
0x15d9   :  { %4447 = vmatpush3.xpose.msk.msra.mxu0 %vm264_vm4, %v2485_v37 }
0x15da   :  { %4456 = vmatprep.subr.mxu0 %v4759_v51 }
0x15dc   :  { %4449 = vmatmul.mubr.msk.f32.vlgmr.msra.gmra.mrb[30].mxu0 %vm264_vm4, %v2483_v34 }
0x15dd   :  { %4458 = vmatprep.mubr.msk.f32.mxu0 %vm4760_vm3, %v4759_v51 }
0x16a3   :  { %v2634_v35 = vpop.f32.mrb[44].mxu1 }
0x16a4   :  { %v2639_v38 = vmul.f32 0.35355338, %v2634_v35  ;;  %v2401_v39 = vpop.f32.mrb[26].mxu0  ;;  %v4455_v40 = vpop.f32.mrb[45].mxu1 }
0x16a5   :  { %v4440_v41 = vpop.f32.mrb[27].mxu0 }
0x16a6   :  { %v2641_v42 = vsel %vm4958_vm5, %v2639_v38, -1e+30 }
0x16a7   :  { %v2645_v43 = vsel %vm264_vm4, %v2641_v42, -inf }
0x16a8   :  { %v2477_v44 = vpop.f32.mrb[28].mxu0  ;;  %2646 = vmax.xlane.f32.xlu0 %v2645_v43 }
0x16a9   :  { %v2481_v45 = vpack.c.bf16 %v2477_v44, %v2401_v39  ;;  %v4445_v46 = vpop.f32.mrb[29].mxu0 }
0x16af   :  { %v2556_v47 = vpop.f32.mrb[30].mxu0 }
0x16b0   :  { %v2638_v48 = vmul.f32 0.35355338, %v2556_v47  ;;  %v4450_v49 = vpop.f32.mrb[31].mxu0 }
0x16b2   :  { %v2640_v50 = vsel %vm4958_vm5, %v2638_v48, -1e+30 }
0x16b3   :  { %v2642_v52 = vsel %vm264_vm4, %v2640_v50, -inf }
0x16b4   :  { %2643 = vmax.xlane.f32.xlu1 %v2642_v52 }
0x1735   :  { %v2647_v53 = vpop.xlane.xlu0 %2646 }
0x1736   :  { %v2649_v12 = vsub.f32 %v2641_v42, %v2647_v53 }
0x1738   :  { %v2652_v54 = vmul.f32 1.442695, %v2649_v12 }
0x173a   :  { %4693 = vpow2.f32 %v2652_v54 }
0x1741   :  { %v2644_v56 = vpop.xlane.xlu1 %2643 }
0x1742   :  { %v2648_v57 = vsub.f32 %v2640_v50, %v2644_v56 }
0x1744   :  { %v4694_v59 = vpop.eup %4693  ;;  %v2650_v61 = vmul.f32 1.442695, %v2648_v57 }
0x1745   :  { %v2657_v62 = vsel %vm264_vm4, %v4694_v59, 0.0 }
0x1746   :  { %4695 = vpow2.f32 %v2650_v61  ;;  %2658 = vadd.xlane.f32.xlu1 %v2657_v62 }
0x1750   :  { %v4696_v0 = vpop.eup %4695 }
0x1751   :  { %v2654_v1 = vsel %vm264_vm4, %v4696_v0, 0.0 }
0x1752   :  { %2655 = vadd.xlane.f32.xlu0 %v2654_v1 }
0x1757   :  { %2740 = vrot.lane.b32.xlu1 %v5250_v63, %s4765_s23 }
0x175b   :  { %2991 = vrot.lane.b32.xlu1 %v5250_v63, %s4766_s24 }
0x175f   :  { %2913 = vrot.lane.b32.xlu1 %v5248_v60, %s4766_s24 }
0x1768   :  { %2664 = vrot.lane.b32.xlu0 %v5248_v60, %s4765_s23 }
0x176c   :  { %2989 = vrot.lane.b32.xlu0 %v5250_v63, %s4767_s25 }
0x1770   :  { %2911 = vrot.lane.b32.xlu0 %v5248_v60, %s4767_s25 }
0x17d3   :  { %v2659_v2 = vpop.xlane.xlu1 %2658 }
0x17d4   :  { %4697 = vrcp.f32 %v2659_v2 }
0x17d7   :  { %v2741_v3 = vpop.permute.xlu1 %2740 }
0x17d8   :  { %4462 = vmatpush3.msra.mxu1 %v2741_v3 }
0x17d9   :  { %4472 = vmatprep.subr.bf16.mxu1 %v4759_v51 }
0x17db   :  { %v2992_v55 = vpop.permute.xlu1 %2991 }
0x17de   :  { %v4698_v5 = vpop.eup %4697 }
0x17df   :  { %v2663_v6 = vmul.f32 %v4698_v5, %v4694_v59  ;;  %v2656_v8 = vpop.xlane.xlu0 %2655  ;;  %v2914_v29 = vpop.permute.xlu1 %2913 }
0x17e0   :  { %4699 = vrcp.f32 %v2656_v8 }
0x17e1   :  { %4464 = vmatmul.mubr.msk.f32.vlgmr.msra.gmra.mrb[46].mxu1 %vm264_vm4, %v2663_v6 }
0x17e2   :  { %4473 = vmatpush3.bf16.msra.mxu1 %v2868_v7  ;;  %4474 = vmatprep.mubr.msk.bf16.mxu1 %vm4760_vm3, %v4759_v51 }
0x17e3   :  { %v2665_v9 = vpop.permute.xlu0 %2664  ;;  %4483 = vmatprep.subr.mxu1 %v4759_v51 }
0x17e4   :  { %4457 = vmatpush3.msra.mxu0 %v2665_v9 }
0x17e5   :  { %4475 = vmatmul.mubr.msk.bf16.vlgmr.msra.gmra.mrb[48].mxu1 %vm264_vm4, %v2481_v45  ;;  %4466 = vmatprep.subr.bf16.mxu0 %v4759_v51 }
0x17e6   :  { %4485 = vmatprep.mubr.msk.f32.mxu1 %vm4760_vm3, %v4759_v51 }
0x17e7   :  { %v2990_v58 = vpop.permute.xlu0 %2989 }
0x17ea   :  { %v4700_v10 = vpop.eup %4699 }
0x17eb   :  { %v2662_v11 = vmul.f32 %v4700_v10, %v4696_v0  ;;  %4484 = vmatpush3.xpose.msk.msra.mxu1 %vm264_vm4, %v2992_v55  ;;  %v2912_v18 = vpop.permute.xlu0 %2911 }
0x17ec   :  { %4493 = vmatprep.subr.mxu1 %v4759_v51 }
0x17ed   :  { %4459 = vmatmul.mubr.msk.f32.vlgmr.msra.gmra.mrb[32].mxu0 %vm264_vm4, %v2662_v11 }
0x17ee   :  { %4486 = vmatmul.mubr.msk.f32.vlgmr.msra.gmra.mrb[52].mxu1 %vm264_vm4, %v2990_v58  ;;  %4468 = vmatprep.mubr.msk.bf16.mxu0 %vm4760_vm3, %v4759_v51 }
0x17ef   :  { %4495 = vmatprep.mubr.msk.f32.mxu1 %vm4760_vm3, %v4759_v51  ;;  %4467 = vmatpush3.bf16.msra.mxu0 %v2821_v14 }
0x17f0   :  { %4478 = vmatprep.subr.mxu0 %v4759_v51 }
0x18b4   :  { %v2812_v16 = vpop.f32.mrb[46].mxu1 }
0x18b5   :  { %v4465_v19 = vpop.f32.mrb[47].mxu1 }
0x18b8   :  { %v2904_v20 = vpop.f32.mrb[48].mxu1 }
0x18b9   :  { %v4476_v21 = vpop.f32.mrb[49].mxu1 }
0x18ba   :  { %v2907_v22 = vpop.f32.mrb[50].mxu1 }
0x18bb   :  { %v4477_v36 = vpop.f32.mrb[51].mxu1 }
0x18c0   :  { %v2736_v24 = vpop.f32.mrb[32].mxu0 }
0x18c1   :  { %v2816_v26 = vpack.c.bf16 %v2812_v16, %v2736_v24  ;;  %v4460_v37 = vpop.f32.mrb[33].mxu0  ;;  %v3063_v27 = vpop.f32.mrb[52].mxu1 }
0x18c2   :  { %v3068_v28 = vmul.f32 0.35355338, %v3063_v27  ;;  %v4487_v15 = vpop.f32.mrb[53].mxu1 }
0x18c3   :  { %4469 = vmatmul.mubr.msk.bf16.vlgmr.msra.gmra.mrb[36].mxu0 %vm264_vm4, %v2816_v26 }
0x18c4   :  { %4479 = vmatpush3.xpose.msk.msra.mxu0 %vm264_vm4, %v2914_v29  ;;  %v3070_v30 = vsel %vm4958_vm5, %v3068_v28, -1e+30  ;;  %4480 = vmatprep.mubr.msk.f32.mxu0 %vm4760_vm3, %v4759_v51 }
0x18c5   :  { %v3074_v31 = vsel %vm264_vm4, %v3070_v30, -inf  ;;  %4488 = vmatprep.subr.mxu0 %v4759_v51 }
0x18c6   :  { %3075 = vmax.xlane.f32.xlu1 %v3074_v31 }
0x18cb   :  { %4481 = vmatmul.mubr.msk.f32.vlgmr.msra.gmra.mrb[34].mxu0 %vm264_vm4, %v2912_v18 }
0x18cc   :  { %4490 = vmatprep.mubr.msk.f32.mxu0 %vm4760_vm3, %v4759_v51 }
0x18d7   :  { %3297 = vrot.lane.b32.xlu1 %v5248_v60, %s4768_s29 }
0x18db   :  { %3295 = vrot.lane.b32.xlu1 %v5248_v60, %s4769_s30 }
0x18df   :  { %3373 = vrot.lane.b32.xlu1 %v5250_v63, %s4769_s30 }
0x1953   :  { %v3076_v32 = vpop.xlane.xlu1 %3075 }
0x1954   :  { %v3078_v33 = vsub.f32 %v3070_v30, %v3076_v32 }
0x1956   :  { %v3081_v34 = vmul.f32 1.442695, %v3078_v33 }
0x1957   :  { %v3298_v53 = vpop.permute.xlu1 %3297 }
0x1958   :  { %4701 = vpow2.f32 %v3081_v34 }
0x195b   :  { %v3296_v56 = vpop.permute.xlu1 %3295 }
0x195f   :  { %v3374_v57 = vpop.permute.xlu1 %3373 }
0x1962   :  { %v4702_v35 = vpop.eup %4701 }
0x1963   :  { %v3086_v38 = vsel %vm264_vm4, %v4702_v35, 0.0 }
0x1964   :  { %3087 = vadd.xlane.f32.xlu0 %v3086_v38 }
0x197a   :  { %3169 = vrot.lane.b32.xlu0 %v5250_v63, %s4770_s2 }
0x197e   :  { %3375 = vrot.lane.b32.xlu0 %v5250_v63, %s4768_s29 }
0x1996   :  { %v2857_v39 = vpop.f32.mrb[36].mxu0 }
0x1997   :  { %v5374_v40 = vadd.f32 %v2904_v20, %v2857_v39  ;;  %v4470_v41 = vpop.f32.mrb[37].mxu0  ;;  %v4047_v20 = vld [vmem:[%s5538_s4 + $0x18] sm:$0xf] }
0x1998   :  { %v2860_v42 = vpop.f32.mrb[38].mxu0  ;;  %v3250_v21 = vsel %vm935_vm6, %v4047_v20, 0 }
0x1999   :  { %v5376_v43 = vadd.f32 %v2907_v22, %v2860_v42  ;;  %v4471_v44 = vpop.f32.mrb[39].mxu0  ;;  %v4048_v42 = vld [vmem:[%s5538_s4 + $0x1c] sm:$0xf] }
0x199a   :  { %v3634_v44 = vsel %vm935_vm6, %v4048_v42, 0  ;;  %v4084_v42 = vld [vmem:[%s5543_s9 + $0x1] ss:$0 sm:$0xff] }
0x199e   :  { %v2985_v45 = vpop.f32.mrb[34].mxu0 }
0x199f   :  { %v3067_v46 = vmul.f32 0.35355338, %v2985_v45  ;;  %v4482_v47 = vpop.f32.mrb[35].mxu0 }
0x19a1   :  { %v3069_v48 = vsel %vm4958_vm5, %v3067_v46, -1e+30 }
0x19a2   :  { %v3071_v49 = vsel %vm264_vm4, %v3069_v48, -inf }
0x19a3   :  { %3072 = vmax.xlane.f32.xlu0 %v3071_v49 }
0x19b9   :  { %3093 = vrot.lane.b32.xlu0 %v5248_v60, %s4770_s2 }
0x19bd   :  { %3477 = vrot.lane.b32.xlu0 %v5248_v60, %s4771_s11 }
0x19f1   :  { %v3088_v50 = vpop.xlane.xlu0 %3087 }
0x19f2   :  { %4703 = vrcp.f32 %v3088_v50 }
0x19f5   :  { %v3170_v52 = vpop.permute.xlu0 %3169 }
0x19f6   :  { %4494 = vmatpush3.msra.mxu1 %v3170_v52 }
0x19f7   :  { %4504 = vmatprep.subr.mxu1 %v4759_v51 }
0x19f9   :  { %v3376_v60 = vpop.permute.xlu0 %3375 }
0x19fc   :  { %v4704_v12 = vpop.eup %4703 }
0x19fd   :  { %v3092_v54 = vmul.f32 %v4704_v12, %v4702_v35 }
0x19ff   :  { %4496 = vmatmul.mubr.msk.f32.vlgmr.msra.gmra.mrb[54].mxu1 %vm264_vm4, %v3092_v54 }
0x1a00   :  { %4505 = vmatpush3.xpose.msk.msra.mxu1 %vm264_vm4, %v3298_v53  ;;  %4506 = vmatprep.mubr.msk.f32.mxu1 %vm4760_vm3, %v4759_v51 }
0x1a01   :  { %4509 = vmatprep.subr.mxu1 %v4759_v51 }
0x1a03   :  { %4507 = vmatmul.mubr.msk.f32.vlgmr.msra.gmra.mrb[56].mxu1 %vm264_vm4, %v3296_v56 }
0x1a04   :  { %4510 = vmatpush3.xpose.msk.msra.mxu1 %vm264_vm4, %v3376_v60  ;;  %4511 = vmatprep.mubr.msk.f32.mxu1 %vm4760_vm3, %v4759_v51 }
0x1a05   :  { %4519 = vmatprep.subr.mxu1 %v4759_v51 }
0x1a07   :  { %4512 = vmatmul.mubr.msk.f32.vlgmr.msra.gmra.mrb[58].mxu1 %vm264_vm4, %v3374_v57 }
0x1a08   :  { %4521 = vmatprep.mubr.msk.f32.mxu1 %vm4760_vm3, %v4759_v51 }
0x1a30   :  { %v3073_v59 = vpop.xlane.xlu0 %3072 }
0x1a31   :  { %v3077_v61 = vsub.f32 %v3069_v48, %v3073_v59 }
0x1a33   :  { %v3079_v62 = vmul.f32 1.442695, %v3077_v61 }
0x1a34   :  { %v3094_v0 = vpop.permute.xlu0 %3093 }
0x1a35   :  { %4705 = vpow2.f32 %v3079_v62  ;;  %4489 = vmatpush3.msra.mxu0 %v3094_v0 }
0x1a36   :  { %4498 = vmatprep.subr.bf16.mxu0 %v4759_v51 }
0x1a38   :  { %v3478_v32 = vpop.permute.xlu0 %3477 }
0x1a3f   :  { %v4706_v1 = vpop.eup %4705 }
0x1a40   :  { %v3083_v2 = vsel %vm264_vm4, %v4706_v1, 0.0 }
0x1a41   :  { %3084 = vadd.xlane.f32.xlu1 %v3083_v2 }
0x1ace   :  { %v3085_v3 = vpop.xlane.xlu1 %3084 }
0x1acf   :  { %4707 = vrcp.f32 %v3085_v3 }
0x1ad2   :  { %v3241_v4 = vpop.f32.mrb[54].mxu1 }
0x1ad3   :  { %v4497_v5 = vpop.f32.mrb[55].mxu1 }
0x1ad6   :  { %v3369_v6 = vpop.f32.mrb[56].mxu1 }
0x1ad7   :  { %v3451_v8 = vmul.f32 0.35355338, %v3369_v6  ;;  %v4508_v7 = vpop.f32.mrb[57].mxu1 }
0x1ad9   :  { %v4708_v9 = vpop.eup %4707  ;;  %v3453_v10 = vsel %vm4958_vm5, %v3451_v8, -1e+30 }
0x1ada   :  { %v3091_v55 = vmul.f32 %v4708_v9, %v4706_v1  ;;  %v3447_v11 = vpop.f32.mrb[58].mxu1  ;;  %v3455_v58 = vsel %vm264_vm4, %v3453_v10, -inf }
0x1adb   :  { %v3452_v13 = vmul.f32 0.35355338, %v3447_v11  ;;  %3456 = vmax.xlane.f32.xlu1 %v3455_v58  ;;  %v4513_v14 = vpop.f32.mrb[59].mxu1 }
0x1adc   :  { %4491 = vmatmul.mubr.msk.f32.vlgmr.msra.gmra.mrb[40].mxu0 %vm264_vm4, %v3091_v55  ;;  %v4624_v14 = vld [vmem:[%s5539_s5 + $0x18] sm:$0xff]  }
0x1add   :  { %v3454_v16 = vsel %vm4958_vm5, %v3452_v13, -1e+30  ;;  %4500 = vmatprep.mubr.msk.bf16.mxu0 %vm4760_vm3, %v4759_v51  ;;  %4499 = vmatpush3.bf16.msra.mxu0 %v3250_v21  ;;  %v4623_v13 = vld [vmem:[%s5539_s5 + $0x10] sm:$0xff]  }
0x1ade   :  { %v3458_v19 = vsel %vm264_vm4, %v3454_v16, -inf  ;;  %4514 = vmatprep.subr.mxu0 %v4759_v51 }
0x1adf   :  { %3459 = vmax.xlane.f32.xlu1 %v3458_v19 }
0x1b68   :  { %v3457_v22 = vpop.xlane.xlu1 %3456 }
0x1b69   :  { %v3461_v36 = vsub.f32 %v3453_v10, %v3457_v22 }
0x1b6b   :  { %v3463_v24 = vmul.f32 1.442695, %v3461_v36 }
0x1b6c   :  { %v3460_v17 = vpop.xlane.xlu1 %3459 }
0x1b6d   :  { %4709 = vpow2.f32 %v3463_v24  ;;  %v3462_v26 = vsub.f32 %v3454_v16, %v3460_v17 }
0x1b6f   :  { %v3465_v37 = vmul.f32 1.442695, %v3462_v26  ;;  %v4078_v26 = vld [vmem:[%s5541_s7 + $0x8] ss:$0 sm:$0xff] }
0x1b71   :  { %4711 = vpow2.f32 %v3465_v37 }
0x1b77   :  { %v4710_v27 = vpop.eup %4709 }
0x1b78   :  { %v3467_v28 = vsel %vm264_vm4, %v4710_v27, 0.0 }
0x1b79   :  { %3468 = vadd.xlane.f32.xlu1 %v3467_v28 }
0x1b7b   :  { %v4712_v15 = vpop.eup %4711 }
0x1b7c   :  { %v3470_v29 = vsel %vm264_vm4, %v4712_v15, 0.0 }
0x1b7d   :  { %3471 = vadd.xlane.f32.xlu1 %v3470_v29 }
0x1b8e   :  { %3553 = vrot.lane.b32.xlu1 %v5250_v63, %s4771_s11 }
0x1baf   :  { %v3165_v30 = vpop.f32.mrb[40].mxu0 }
0x1bb0   :  { %v3245_v31 = vpack.c.bf16 %v3241_v4, %v3165_v30  ;;  %v4492_v18 = vpop.f32.mrb[41].mxu0 }
0x1bb2   :  { %4501 = vmatmul.mubr.msk.bf16.vlgmr.msra.gmra.mrb[44].mxu0 %vm264_vm4, %v3245_v31 }
0x1bb3   :  { %4515 = vmatpush3.msra.mxu0 %v3478_v32  ;;  %4516 = vmatprep.mubr.msk.f32.mxu0 %vm4760_vm3, %v4759_v51  ;;  %v4625_v32 = vld [vmem:[%s5540_s6 + $0x40] sm:$0xff]  }
0x1bb4   :  { %4524 = vmatprep.subr.bf16.mxu0 %v4759_v51 }
0x1c06   :  { %v3469_v33 = vpop.xlane.xlu1 %3468 }
0x1c07   :  { %4713 = vrcp.f32 %v3469_v33  ;;  %v4626_v33 = vld [vmem:[%s5540_s6 + $0x48] sm:$0xff]  }
0x1c0a   :  { %v3472_v34 = vpop.xlane.xlu1 %3471 }
0x1c0b   :  { %4715 = vrcp.f32 %v3472_v34  ;;  %v4627_v34 = vld [vmem:[%s5540_s6 + $0x50] sm:$0xff]  }
0x1c0e   :  { %v3554_v35 = vpop.permute.xlu1 %3553 }
0x1c0f   :  { %4520 = vmatpush3.msra.mxu1 %v3554_v35  ;;  %v4628_v35 = vld [vmem:[%s5540_s6 + $0x58] sm:$0xff]  }
0x1c10   :  { %4530 = vmatprep.subr.bf16.mxu1 %v4759_v51 }
0x1c11   :  { %v4714_v63 = vpop.eup %4713 }
0x1c12   :  { %v3475_v38 = vmul.f32 %v4714_v63, %v4710_v27  ;;  %v4629_v63 = vld [vmem:[%s5540_s6 + $0x60] sm:$0xff]  }
0x1c14   :  { %4517 = vmatmul.mubr.msk.f32.vlgmr.msra.gmra.mrb[42].mxu0 %vm264_vm4, %v3475_v38  ;;  %v4630_v38 = vld [vmem:[%s5540_s6 + $0x68] sm:$0xff]  }
0x1c15   :  { %v4716_v39 = vpop.eup %4715  ;;  %4526 = vmatprep.mubr.msk.bf16.mxu0 %vm4760_vm3, %v4759_v51  ;;  %4525 = vmatpush3.bf16.msra.mxu0 %v3634_v44 }
0x1c16   :  { %v3476_v41 = vmul.f32 %v4716_v39, %v4712_v15  ;;  %4538 = vmatprep.subr.bf16.mxu0 %v4759_v51  ;;  %v4079_v15 = vld [vmem:[%s5541_s7 + $0x9] ss:$0 sm:$0xff]  ;;  %v4631_v39 = vld [vmem:[%s5540_s6 + $0x70] sm:$0xff]  }
0x1c18   :  { %4522 = vmatmul.mubr.msk.f32.vlgmr.msra.gmra.mrb[60].mxu1 %vm264_vm4, %v3476_v41  ;;  %v4632_v41 = vld [vmem:[%s5540_s6 + $0x78] sm:$0xff]  }
0x1c19   :  { %4534 = vmatprep.mubr.msk.bf16.mxu1 %vm4760_vm3, %v4759_v51  ;;  %4531 = vmatpush3.bf16.msra.mxu1 %v4623_v13 }
0x1c1a   :  { %4532 = vmatprep.subr.bf16.mxu1 %v4759_v51 }
0x1c1d   :  { %4533 = vmatpush3.bf16.msra.mxu1 %v4624_v14 }
0x1c85   :  { %v3286_v45 = vpop.f32.mrb[44].mxu0 }
0x1c86   :  { %v3293_v46 = vadd.f32 %v3286_v45, %v5374_v40  ;;  %v4502_v47 = vpop.f32.mrb[45].mxu0  ;;  %v4077_v40 = vld [vmem:[%s5541_s7 + $0xa] ss:$0 sm:$0xff] }
0x1c87   :  { %v3289_v48 = vpop.f32.mrb[46].mxu0 }
0x1c88   :  { %v3294_v49 = vadd.f32 %v3289_v48, %v5376_v43  ;;  %v4503_v50 = vpop.f32.mrb[47].mxu0 }
0x1ce7   :  { %v3549_v52 = vpop.f32.mrb[42].mxu0 }
0x1ce8   :  { %v4518_v53 = vpop.f32.mrb[43].mxu0 }
0x1ceb   :  { %v3625_v12 = vpop.f32.mrb[60].mxu1 }
0x1cec   :  { %v3629_v54 = vpack.c.bf16 %v3625_v12, %v3549_v52  ;;  %v4523_v56 = vpop.f32.mrb[61].mxu1 }
0x1cee   :  { %4527 = vmatmul.mubr.msk.bf16.vlgmr.msra.gmra.mrb[48].mxu0 %vm264_vm4, %v3629_v54 }
0x1cef   :  { %4554 = vmatprep.mubr.msk.bf16.mxu0 %vm4760_vm3, %v4759_v51  ;;  %4539 = vmatpush3.bf16.msra.mxu0 %v4625_v32 }
0x1cf0   :  { %4540 = vmatprep.subr.bf16.mxu0 %v4759_v51 }
0x1cf3   :  { %4541 = vmatpush3.bf16.msra.mxu0 %v4626_v33 }
0x1cf4   :  { %4542 = vmatprep.subr.bf16.mxu0 %v4759_v51 }
0x1cf7   :  { %4543 = vmatpush3.bf16.msra.mxu0 %v4627_v34 }
0x1cf8   :  { %4544 = vmatprep.subr.bf16.mxu0 %v4759_v51 }
0x1cfb   :  { %4545 = vmatpush3.bf16.msra.mxu0 %v4628_v35 }
0x1cfc   :  { %4546 = vmatprep.subr.bf16.mxu0 %v4759_v51 }
0x1cff   :  { %4547 = vmatpush3.bf16.msra.mxu0 %v4629_v63 }
0x1d00   :  { %4548 = vmatprep.subr.bf16.mxu0 %v4759_v51 }
0x1d03   :  { %4549 = vmatpush3.bf16.msra.mxu0 %v4630_v38 }
0x1d04   :  { %4550 = vmatprep.subr.bf16.mxu0 %v4759_v51 }
0x1d07   :  { %4551 = vmatpush3.bf16.msra.mxu0 %v4631_v39 }
0x1d08   :  { %4552 = vmatprep.subr.bf16.mxu0 %v4759_v51 }
0x1d0b   :  { %4553 = vmatpush3.bf16.msra.mxu0 %v4632_v41 }
0x1dc1   :  { %v3670_v60 = vpop.f32.mrb[48].mxu0 }
0x1dc2   :  { %v3677_v57 = vadd.f32 %v3670_v60, %v3293_v46  ;;  %v4528_v59 = vpop.f32.mrb[49].mxu0 }
0x1dc3   :  { %v3673_v61 = vpop.f32.mrb[50].mxu0 }
0x1dc4   :  { %v3679_v43 = vadd.f32 %v3677_v57, %v5215_v23  ;;  %v3678_v62 = vadd.f32 %v3673_v61, %v3294_v49  ;;  %v4529_v0 = vpop.f32.mrb[51].mxu0 }
0x1dc5   :  { %v4112_v0 = vld [vmem:[%s5541_s7 + $0xb] ss:$0 sm:$0xff] }
0x1dc6   :  { %v5444_v1 = vadd.f32 %v4077_v40, %v3679_v43  ;;  %v3680_v2 = vadd.f32 %v3678_v62, %v5218_v25 }
0x1dc8   :  { %v5447_v3 = vadd.f32 %v4077_v40, %v3680_v2  ;;  %v3690_v4 = vsel %vm151_vm2, %v5444_v1, 0.0 }
0x1dc9   :  { %3691 = vadd.xlane.f32.xlu0 %v3690_v4 }
0x1dca   :  { %v3693_v5 = vsel %vm151_vm2, %v5447_v3, 0.0 }
0x1dcb   :  { %3694 = vadd.xlane.f32.xlu1 %v3693_v5 }
0x1e56   :  { %v3692_v6 = vpop.xlane.xlu0 %3691 }
0x1e57   :  { %v3696_v8 = vmul.f32 0.03125, %v3692_v6 }
0x1e58   :  { %v3695_v7 = vpop.xlane.xlu1 %3694 }
0x1e59   :  { %v3698_v23 = vsub.f32 %v5444_v1, %v3696_v8  ;;  %v3697_v9 = vmul.f32 0.03125, %v3695_v7 }
0x1e5b   :  { %v3699_v10 = vsub.f32 %v5447_v3, %v3697_v9  ;;  %v3700_v55 = vmul.f32 %v3698_v23, %v3698_v23 }
0x1e5d   :  { %v3702_v25 = vsel %vm151_vm2, %v3700_v55, 0.0  ;;  %v3701_v11 = vmul.f32 %v3699_v10, %v3699_v10 }
0x1e5e   :  { %3703 = vadd.xlane.f32.xlu0 %v3702_v25 }
0x1e5f   :  { %v3705_v58 = vsel %vm151_vm2, %v3701_v11, 0.0 }
0x1e62   :  { %3706 = vadd.xlane.f32.xlu0 %v3705_v58 }
0x1eeb   :  { %v3704_v16 = vpop.xlane.xlu0 %3703 }
0x1eec   :  { %v3708_v19 = vmul.f32 0.03125, %v3704_v16 }
0x1eee   :  { %v3710_v20 = vadd.f32 1e-05, %v3708_v19 }
0x1eef   :  { %v3707_v21 = vpop.xlane.xlu0 %3706 }
0x1ef0   :  { %4717 = vrsqrt.f32 %v3710_v20  ;;  %v3709_v22 = vmul.f32 0.03125, %v3707_v21 }
0x1ef2   :  { %v3711_v36 = vadd.f32 1e-05, %v3709_v22 }
0x1ef4   :  { %4719 = vrsqrt.f32 %v3711_v36 }
0x1efa   :  { %v4718_v24 = vpop.eup %4717 }
0x1efb   :  { %v3714_v17 = vmul.f32 %v4718_v24, %v3698_v23 }
0x1efd   :  { %v3720_v27 = vmul.f32 %v4078_v26, %v3714_v17 }
0x1efe   :  { %v4720_v37 = vpop.eup %4719 }
0x1eff   :  { %v3715_v28 = vmul.f32 %v4720_v37, %v3699_v10  ;;  %v3726_v30 = vadd.f32 %v4079_v15, %v3720_v27  ;;  %v4113_v37 = vld [vmem:[%s5541_s7 + $0xc] ss:$0 sm:$0xff] }
0x1f01   :  { %v3721_v29 = vmul.f32 %v4078_v26, %v3715_v28  ;;  %v4114_v28 = vld [vmem:[%s5541_s7 + $0xd] ss:$0 sm:$0xff] }
0x1f03   :  { %v3727_v31 = vadd.f32 %v4079_v15, %v3721_v29 }
0x1f05   :  { %v3728_v18 = vpack.c.bf16 %v3727_v31, %v3726_v30 }
0x1f07   :  { %4535 = vmatmul.mubr.msk.bf16.vlgmr.msra.gmra.mrb[64].mxu1 %vm151_vm2, %v3728_v18 }
0x1fda   :  { %v3788_v44 = vpop.f32.mrb[64].mxu1 }
0x1fdb   :  { %v3789_v45 = vadd.f32 %v4084_v42, %v3788_v44  ;;  %v4536_v46 = vpop.f32.mrb[65].mxu1 }
0x1fdc   :  { %v3791_v47 = vpop.f32.mrb[66].mxu1 }
0x1fdd   :  { %v3795_v48 = vmul.f32 -1.702, %v3789_v45  ;;  %v3792_v49 = vadd.f32 %v4084_v42, %v3791_v47  ;;  %v4537_v50 = vpop.f32.mrb[67].mxu1 }
0x1fdf   :  { %v3797_v52 = vmul.f32 1.442695, %v3795_v48  ;;  %v3796_v53 = vmul.f32 -1.702, %v3792_v49 }
0x1fe1   :  { %4721 = vpow2.f32 %v3797_v52  ;;  %v3799_v51 = vmul.f32 1.442695, %v3796_v53 }
0x1fe3   :  { %4723 = vpow2.f32 %v3799_v51 }
0x1feb   :  { %v4722_v12 = vpop.eup %4721 }
0x1fec   :  { %v3801_v54 = vadd.f32 1.0, %v4722_v12 }
0x1fed   :  { %v4724_v56 = vpop.eup %4723 }
0x1fee   :  { %4725 = vrcp.f32 %v3801_v54  ;;  %v3802_v60 = vadd.f32 1.0, %v4724_v56 }
0x1ff0   :  { %4727 = vrcp.f32 %v3802_v60 }
0x1ff8   :  { %v4726_v57 = vpop.eup %4725 }
0x1ff9   :  { %v3805_v40 = vmul.f32 %v4726_v57, %v3789_v45 }
0x1ffa   :  { %v4728_v59 = vpop.eup %4727 }
0x1ffb   :  { %v3806_v61 = vmul.f32 %v4728_v59, %v3792_v49 }
0x1ffd   :  { %v3807_v43 = vpack.c.bf16 %v3806_v61, %v3805_v40 }
0x1fff   :  { %4555 = vmatmul.mubr.bf16.vlgmr.msra.gmra.mrb[52].mxu0 %v3807_v43 }
0x20d2   :  { %v3907_v62 = vpop.f32.mrb[52].mxu0 }
0x20d3   :  { %v3914_v2 = vadd.f32 %v3907_v62, %v5444_v1  ;;  %v4556_v4 = vpop.f32.mrb[53].mxu0 }
0x20d4   :  { %v3910_v5 = vpop.f32.mrb[54].mxu0 }
0x20d5   :  { %v3915_v6 = vadd.f32 %v3910_v5, %v5447_v3  ;;  %v4557_v8 = vpop.f32.mrb[55].mxu0  ;;  %v3921_v7 = vadd.f32 %v4112_v0, %v3914_v2 }
0x20d7   :  { %v3922_v23 = vadd.f32 %v4112_v0, %v3915_v6  ;;  %v3925_v9 = vsel %vm151_vm2, %v3921_v7, 0.0 }
0x20d8   :  { %3926 = vadd.xlane.f32.xlu0 %v3925_v9 }
0x20d9   :  { %v3928_v10 = vsel %vm151_vm2, %v3922_v23, 0.0 }
0x20dc   :  { %3929 = vadd.xlane.f32.xlu0 %v3928_v10 }
0x2165   :  { %v3927_v55 = vpop.xlane.xlu0 %3926 }
0x2166   :  { %v3931_v25 = vmul.f32 0.03125, %v3927_v55 }
0x2168   :  { %v3933_v11 = vsub.f32 %v3921_v7, %v3931_v25 }
0x2169   :  { %v3930_v58 = vpop.xlane.xlu0 %3929 }
0x216a   :  { %v3932_v13 = vmul.f32 0.03125, %v3930_v58  ;;  %v3935_v14 = vmul.f32 %v3933_v11, %v3933_v11 }
0x216c   :  { %v3934_v1 = vsub.f32 %v3922_v23, %v3932_v13  ;;  %v3937_v16 = vsel %vm151_vm2, %v3935_v14, 0.0 }
0x216d   :  { %3938 = vadd.xlane.f32.xlu0 %v3937_v16 }
0x216e   :  { %v3936_v3 = vmul.f32 %v3934_v1, %v3934_v1 }
0x2170   :  { %v3940_v19 = vsel %vm151_vm2, %v3936_v3, 0.0 }
0x2171   :  { %3941 = vadd.xlane.f32.xlu1 %v3940_v19 }
0x21fa   :  { %v3939_v20 = vpop.xlane.xlu0 %3938 }
0x21fb   :  { %v3943_v21 = vmul.f32 0.03125, %v3939_v20 }
0x21fd   :  { %v3945_v22 = vadd.f32 1e-05, %v3943_v21 }
0x21fe   :  { %v3942_v36 = vpop.xlane.xlu1 %3941 }
0x21ff   :  { %4729 = vrsqrt.f32 %v3945_v22  ;;  %v3944_v24 = vmul.f32 0.03125, %v3942_v36 }
0x2201   :  { %v3946_v17 = vadd.f32 1e-05, %v3944_v24 }
0x2203   :  { %4731 = vrsqrt.f32 %v3946_v17 }
0x2209   :  { %v4730_v26 = vpop.eup %4729 }
0x220a   :  { %v3949_v27 = vmul.f32 %v4730_v26, %v3933_v11 }
0x220c   :  { %v3955_v15 = vmul.f32 %v4113_v37, %v3949_v27 }
0x220d   :  { %v4732_v29 = vpop.eup %4731 }
0x220e   :  { %v3950_v30 = vmul.f32 %v4732_v29, %v3934_v1  ;;  %v3961_v31 = vadd.f32 %v4114_v28, %v3955_v15 }
0x2210   :  { %v3956_v18 = vmul.f32 %v4113_v37, %v3950_v30  ;;  %3963 = vst.msk [vmem:[#allocation2] sm:$0xff] %vm151_vm2, %v3961_v31 }
0x2212   :  { %v3962_v32 = vadd.f32 %v4114_v28, %v3956_v18 }
0x2214   :  { %3964 = vst.msk [vmem:[#allocation2 + $0x8] sm:$0xff] %vm151_vm2, %v3962_v32 }
0x2215   :  { %4744 = shalt.err (!%p4741_p4)
}
0x2216   :  { %s4745_s1 = scalar_lea.hbm %s5544_s10, 256 }
0x2217   :  { %p4746_p5 = scmp.ne.s32.totalorder %s5544_s10, %s4745_s1  ;;  %p4749_p6 = scmp.lt.u32.totalorder %s4745_s1, %s5544_s10 }
0x2219   :  { %p4751_p7 = pnand %p4749_p6, %p4746_p5 }
0x221b   :  { %4754 = shalt.err (!%p4751_p7)
}
0x221c   :  { %s4773_s14 = smov 128   ;;  %s4774_s3 = smov 8  }
0x221d   :  { %3976 = dma.vmem_to_hbm [thread:$0]  %s3971_s26, 256, %s5544_s10, [#allocation3], %s4773_s14, %s4773_s14, %s4774_s3  }
0x221e   :  { %4755 = dma.done.wait [#allocation3], 256  }
0x221f   :  { %4756 = vsyncadd [#allocation3], 4294967040 }
0x2220   :  { %3980 = vsyncpa [#allocation3], 1 }

</bundles_post_ra>
